<compile_context>
chip_gen: v7x
topology: tpu7x:2x2x1
jax: 0.10.0
libtpu: 0.0.40
codegen_flags: <defaults>
</compile_context>

<pallas_src>
import functools

import jax
import jax.numpy as jnp
from jax.experimental import pallas as pl
from jax.experimental.pallas import tpu as pltpu


def _sigmoid(z):
    # Numerically stable sigmoid (== 1/(1+exp(-z))); tanh runs on the EUP slot.
    return 0.5 * (jnp.tanh(0.5 * z) + 1.0)


def cbam_kernel(x_ref, w1t_ref, w2_ref, col_ref, wsp_ref, out_ref, pbuf_ref,
                *, H, W, K, pad, OFF):
    # x_ref/out_ref : (C, H*W) lane-dense block for one batch element
    # w1t_ref       : (C, Cr)  (= W1.T)      w2_ref: (C, Cr)
    # col_ref       : (1, H*W) int32, col_ref[0, p] = p % W
    # wsp_ref (SMEM): (2*K*K,) spatial conv weights [avg-chan, max-chan]
    # pbuf_ref      : (2, OFF + H*W + OFF) zero-bordered flat pooled maps
    C, HW = x_ref.shape
    Cr = w1t_ref.shape[1]
    PADW = pbuf_ref.shape[1]

    x = x_ref[...].astype(jnp.float32)                          # (C, HW)

    # ---- channel attention: global avg/max pool + shared MLP + sigmoid ----
    avg = jnp.mean(x, axis=1, keepdims=True)                    # (C, 1) lane reduce
    mx = jnp.max(x, axis=1, keepdims=True)                      # (C, 1)
    col2 = jax.lax.broadcasted_iota(jnp.int32, (C, 2), 1)
    pooled = jnp.where(col2 == 0, avg, mx)                      # (C, 2): [:,0]=avg [:,1]=max

    w1t = w1t_ref[...].astype(jnp.float32)                      # (C, Cr)
    w2 = w2_ref[...].astype(jnp.float32)                        # (C, Cr)

    # Tiny MLP (Cr is small): VPU broadcast-multiply + sublane reductions, no MXU.
    z = None
    for j in range(Cr):
        hj = jnp.maximum(
            jnp.sum(w1t[:, j:j + 1] * pooled, axis=0, keepdims=True), 0.0)  # (1, 2)
        term = w2[:, j:j + 1] * hj                                          # (C, 2)
        z = term if z is None else z + term
    ch_att = _sigmoid(jnp.sum(z, axis=1, keepdims=True))        # (C, 1)

    # ---- apply channel attention; xs stays in f32 registers/VMEM ----
    xs = x * ch_att                                             # (C, HW) lane-dense

    # ---- spatial pooling: mean/max over channels = sublane reduction ----
    pm = jnp.mean(xs, axis=0, keepdims=True)                    # (1, HW)
    px = jnp.max(xs, axis=0, keepdims=True)                     # (1, HW)

    # ---- zero-bordered FLAT pooled buffer (row 0 = avg, row 1 = max) ----
    zero_border = jnp.zeros((2, OFF), jnp.float32)
    pbuf_ref[:, 0:OFF] = zero_border
    pbuf_ref[:, OFF + HW:PADW] = zero_border
    pbuf_ref[0:1, OFF:OFF + HW] = pm
    pbuf_ref[1:2, OFF:OFF + HW] = px

    # ---- KxK "same" conv (2 -> 1 channel) in the flat lane domain ----
    # out[p] = sum_{kh,kw} w[kh,kw] * pooled_flat[p + (kh-pad)*W + (kw-pad)]
    # Row out-of-bounds -> reads the zero border; column out-of-bounds -> one
    # lane mask per kw applied to the per-kw partial sum.
    colv = col_ref[...]                                         # (1, HW) int32
    kw_parts = []
    for kw in range(K):
        dw = kw - pad
        # two independent kh accumulation chains (even / odd kh)
        parts = [jnp.zeros((1, HW), jnp.float32),
                 jnp.zeros((1, HW), jnp.float32)]
        for kh in range(K):
            dh = kh - pad
            start = OFF + dh * W + dw                           # static lane offset
            sa = pbuf_ref[0:1, start:start + HW]                # (1, HW) avg map tap
            sb = pbuf_ref[1:2, start:start + HW]                # (1, HW) max map tap
            wa = wsp_ref[0 * K * K + kh * K + kw]               # SMEM scalar weights
            wb = wsp_ref[1 * K * K + kh * K + kw]
            parts[kh % 2] = parts[kh % 2] + sa * wa + sb * wb
        part = parts[0] + parts[1]
        if dw != 0:
            valid = jnp.logical_and(colv + dw >= 0, colv + dw < W)
            part = jnp.where(valid, part, 0.0)
        kw_parts.append(part)
    # balanced tree reduction over the 7 independent per-kw partials
    while len(kw_parts) > 1:
        nxt = [kw_parts[i] + kw_parts[i + 1] for i in range(0, len(kw_parts) - 1, 2)]
        if len(kw_parts) % 2:
            nxt.append(kw_parts[-1])
        kw_parts = nxt
    sp_att = _sigmoid(kw_parts[0])                              # (1, HW)

    # ---- final elementwise multiply; lane-dense (multiple-of-128) store ----
    out_ref[...] = (xs * sp_att).astype(out_ref.dtype)


def cbam_forward(x, w1, w2, w_spatial, kernel_size=7):
    """x: (B, C, H, W); w1: (C//r, C); w2: (C, C//r); w_spatial: (2, k, k)."""
    B, C, H, W = x.shape
    assert kernel_size in (3, 7), "kernel size must be 3 or 7"
    pad = 3 if kernel_size == 7 else 1
    HW = H * W
    assert HW % 128 == 0, "H*W must be a multiple of 128 for the lane-dense layout"
    Cr = w1.shape[0]
    assert Cr >= 1 and w1.shape == (Cr, C) and w2.shape == (C, Cr)

    # flat padded-buffer geometry: data at [OFF, OFF+HW), zero borders of width OFF
    OFF = -(-(pad * W + pad) // 128) * 128                      # >= max |tap shift|, 128-aligned
    PADW = HW + 2 * OFF

    x_flat = x.reshape(B, C, HW)                                # free metadata reshape
    w1t = jnp.transpose(w1)                                     # (C, Cr), tiny one-time transpose
    wsp_flat = w_spatial.reshape(-1).astype(jnp.float32)        # (2*K*K,)
    colmap = (jnp.arange(HW, dtype=jnp.int32) % W).reshape(1, HW)

    kernel = functools.partial(cbam_kernel, H=H, W=W, K=kernel_size, pad=pad, OFF=OFF)

    itemsize = jnp.dtype(x.dtype).itemsize
    cost = pl.CostEstimate(
        flops=int(B * (6 * C * HW + 4 * kernel_size * kernel_size * HW)),
        transcendentals=int(B * (C + HW)),
        bytes_accessed=int(2 * B * C * HW * itemsize
                           + (2 * C * Cr + 2 * kernel_size * kernel_size + HW) * 4),
    )

    out_flat = pl.pallas_call(
        kernel,
        out_shape=jax.ShapeDtypeStruct((B, C, HW), x.dtype),
        grid=(B,),
        in_specs=[
            pl.BlockSpec((None, C, HW), lambda b: (b, 0, 0)),      # x, 1 batch elt / step
            pl.BlockSpec((C, Cr), lambda b: (0, 0)),               # W1.T (resident)
            pl.BlockSpec((C, Cr), lambda b: (0, 0)),               # W2   (resident)
            pl.BlockSpec((1, HW), lambda b: (0, 0)),               # column-index map
            pl.BlockSpec(memory_space=pltpu.MemorySpace.SMEM),     # conv weights as scalars
        ],
        out_specs=pl.BlockSpec((None, C, HW), lambda b: (b, 0, 0)),
        scratch_shapes=[
            pltpu.VMEM((2, PADW), jnp.float32),   # zero-bordered flat avg/max pooled maps
        ],
        compiler_params=pltpu.CompilerParams(
            dimension_semantics=("parallel",)),   # shard batch across TCs on v7x
        cost_estimate=cost,
    )(x_flat, w1t, w2, colmap, wsp_flat)
    return out_flat.reshape(B, C, H, W)


# ---------------------------------------------------------------------------
# Pure-JAX reference (for correctness check)
# ---------------------------------------------------------------------------
def cbam_ref(x, w1, w2, w_spatial_oihw, kernel_size=7):
    pad = 3 if kernel_size == 7 else 1
    avg = x.mean(axis=(2, 3))
    mx = x.max(axis=(2, 3))

    def fc(v):
        return jnp.maximum(v @ w1.T, 0.0) @ w2.T

    ch_att = jax.nn.sigmoid(fc(avg) + fc(mx))
    xs = x * ch_att[:, :, None, None]
    pool = jnp.stack([xs.mean(axis=1), xs.max(axis=1)], axis=1)
    sp = jax.lax.conv_general_dilated(
        pool, w_spatial_oihw, window_strides=(1, 1),
        padding=[(pad, pad), (pad, pad)],
        dimension_numbers=("NCHW", "OIHW", "NCHW"))
    sp_att = jax.nn.sigmoid(sp)
    return xs * sp_att


if __name__ == "__main__":
    B, C, H, W = 2, 32, 16, 16
    reduction = 16
    ksize = 7
    Cr = C // reduction

    key = jax.random.PRNGKey(0)
    kx, k1, k2, k3 = jax.random.split(key, 4)

    x = jax.random.normal(kx, (B, C, H, W), dtype=jnp.float32)
    # 1x1 conv weights of the channel-attention MLP (no bias)
    w1 = 0.2 * jax.random.normal(k1, (Cr, C), dtype=jnp.float32)      # Conv2d(C, C/r, 1)
    w2 = 0.2 * jax.random.normal(k2, (C, Cr), dtype=jnp.float32)      # Conv2d(C/r, C, 1)
    # 7x7 spatial-attention conv weight (out=1, in=2) stored as (2, 7, 7)
    w_sp = 0.1 * jax.random.normal(k3, (2, ksize, ksize), dtype=jnp.float32)

    out = cbam_forward(x, w1, w2, w_sp, kernel_size=ksize)
    out = jax.block_until_ready(out)

    ref = cbam_ref(x, w1, w2, w_sp[None, :, :, :], kernel_size=ksize)
    assert out.shape == (B, C, H, W)
    assert jnp.allclose(out, ref, atol=1e-4, rtol=1e-4), "mismatch vs reference"

    print("KERNEL_OK")
</pallas_src>

<mosaic_0001>
module attributes {stable_mosaic.version = 11 : i64} {
  func.func @cbam_kernel(%arg0: i32, %arg1: memref<1x32x256xf32, #tpu.memory_space<vmem>>, %arg2: memref<32x2xf32, #tpu.memory_space<vmem>>, %arg3: memref<32x2xf32, #tpu.memory_space<vmem>>, %arg4: memref<1x256xi32, #tpu.memory_space<vmem>>, %arg5: memref<98xf32, #tpu.memory_space<smem>>, %arg6: memref<1x32x256xf32, #tpu.memory_space<vmem>>, %arg7: memref<2x512xf32, #tpu.memory_space<vmem>>) attributes {dimension_semantics = [#tpu.dimension_semantics<parallel>], iteration_bounds = array<i64: 2>, scalar_prefetch = 0 : i64, scratch_operands = 1 : i64, tpu.core_type = #tpu.core_type<tc>, window_params = [{transform_indices = @transform_0, window_bounds = array<i64: 1, 32, 256>}, {pipeline_mode = #tpu.pipeline_mode<synchronous>, transform_indices = @transform_1, window_bounds = array<i64: 32, 2>}, {pipeline_mode = #tpu.pipeline_mode<synchronous>, transform_indices = @transform_2, window_bounds = array<i64: 32, 2>}, {pipeline_mode = #tpu.pipeline_mode<synchronous>, transform_indices = @transform_3, window_bounds = array<i64: 1, 256>}, {transform_indices = @transform_4, window_bounds = array<i64: 98>}, {transform_indices = @transform_5, window_bounds = array<i64: 1, 32, 256>}]} {
    %c0 = arith.constant 0 : index
    %c0_0 = arith.constant 0 : index
    %c0_1 = arith.constant 0 : index
    %0 = vector.load %arg1[%c0, %c0_0, %c0_1] : memref<1x32x256xf32, #tpu.memory_space<vmem>>, vector<1x32x256xf32>
    %1 = vector.shape_cast %0 : vector<1x32x256xf32> to vector<32x256xf32>
    %cst = arith.constant dense<0.000000e+00> : vector<32xf32>
    %2 = vector.multi_reduction <add>, %1, %cst [1] : vector<32x256xf32> to vector<32xf32>
    %3 = vector.shape_cast %2 : vector<32xf32> to vector<32x1xf32>
    %cst_2 = arith.constant 2.560000e+02 : f32
    %4 = vector.broadcast %cst_2 : f32 to vector<32x1xf32>
    %5 = arith.divf %3, %4 : vector<32x1xf32>
    %cst_3 = arith.constant dense<0xFF800000> : vector<32xf32>
    %6 = vector.multi_reduction <maximumf>, %1, %cst_3 [1] : vector<32x256xf32> to vector<32xf32>
    %7 = vector.shape_cast %6 : vector<32xf32> to vector<32x1xf32>
    %8 = tpu.iota {dimensions = array<i32: 1>} : vector<32x2xi32>
    %c0_i32 = arith.constant 0 : i32
    %9 = vector.broadcast %c0_i32 : i32 to vector<32x2xi32>
    %10 = arith.cmpi eq, %8, %9 : vector<32x2xi32>
    %11 = vector.shape_cast %5 : vector<32x1xf32> to vector<32x1xf32>
    %12 = vector.broadcast %11 : vector<32x1xf32> to vector<32x2xf32>
    %13 = vector.shape_cast %7 : vector<32x1xf32> to vector<32x1xf32>
    %14 = vector.broadcast %13 : vector<32x1xf32> to vector<32x2xf32>
    %15 = arith.select %10, %12, %14 : vector<32x2xi1>, vector<32x2xf32>
    %c0_4 = arith.constant 0 : index
    %c0_5 = arith.constant 0 : index
    %16 = vector.load %arg2[%c0_4, %c0_5] : memref<32x2xf32, #tpu.memory_space<vmem>>, vector<32x2xf32>
    %c0_6 = arith.constant 0 : index
    %c0_7 = arith.constant 0 : index
    %17 = vector.load %arg3[%c0_6, %c0_7] : memref<32x2xf32, #tpu.memory_space<vmem>>, vector<32x2xf32>
    %18 = vector.extract_strided_slice %16 {offsets = [0, 0], sizes = [32, 1], strides = [1, 1]} : vector<32x2xf32> to vector<32x1xf32>
    %19 = vector.broadcast %18 : vector<32x1xf32> to vector<32x2xf32>
    %20 = arith.mulf %19, %15 : vector<32x2xf32>
    %cst_8 = arith.constant dense<0.000000e+00> : vector<2xf32>
    %21 = vector.multi_reduction <add>, %20, %cst_8 [0] : vector<32x2xf32> to vector<2xf32>
    %22 = vector.shape_cast %21 : vector<2xf32> to vector<1x2xf32>
    %cst_9 = arith.constant 0.000000e+00 : f32
    %23 = vector.broadcast %cst_9 : f32 to vector<1x2xf32>
    %24 = arith.maximumf %22, %23 : vector<1x2xf32>
    %25 = vector.extract_strided_slice %17 {offsets = [0, 0], sizes = [32, 1], strides = [1, 1]} : vector<32x2xf32> to vector<32x1xf32>
    %26 = vector.broadcast %25 : vector<32x1xf32> to vector<32x2xf32>
    %27 = vector.broadcast %24 : vector<1x2xf32> to vector<32x2xf32>
    %28 = arith.mulf %26, %27 : vector<32x2xf32>
    %29 = vector.extract_strided_slice %16 {offsets = [0, 1], sizes = [32, 1], strides = [1, 1]} : vector<32x2xf32> to vector<32x1xf32>
    %30 = vector.broadcast %29 : vector<32x1xf32> to vector<32x2xf32>
    %31 = arith.mulf %30, %15 : vector<32x2xf32>
    %cst_10 = arith.constant dense<0.000000e+00> : vector<2xf32>
    %32 = vector.multi_reduction <add>, %31, %cst_10 [0] : vector<32x2xf32> to vector<2xf32>
    %33 = vector.shape_cast %32 : vector<2xf32> to vector<1x2xf32>
    %cst_11 = arith.constant 0.000000e+00 : f32
    %34 = vector.broadcast %cst_11 : f32 to vector<1x2xf32>
    %35 = arith.maximumf %33, %34 : vector<1x2xf32>
    %36 = vector.extract_strided_slice %17 {offsets = [0, 1], sizes = [32, 1], strides = [1, 1]} : vector<32x2xf32> to vector<32x1xf32>
    %37 = vector.broadcast %36 : vector<32x1xf32> to vector<32x2xf32>
    %38 = vector.broadcast %35 : vector<1x2xf32> to vector<32x2xf32>
    %39 = arith.mulf %37, %38 : vector<32x2xf32>
    %40 = arith.addf %28, %39 : vector<32x2xf32>
    %cst_12 = arith.constant dense<0.000000e+00> : vector<32xf32>
    %41 = vector.multi_reduction <add>, %40, %cst_12 [1] : vector<32x2xf32> to vector<32xf32>
    %42 = vector.shape_cast %41 : vector<32xf32> to vector<32x1xf32>
    %cst_13 = arith.constant 5.000000e-01 : f32
    %43 = vector.broadcast %cst_13 : f32 to vector<32x1xf32>
    %44 = arith.mulf %43, %42 : vector<32x1xf32>
    %45 = math.tanh %44 : vector<32x1xf32>
    %cst_14 = arith.constant 1.000000e+00 : f32
    %46 = vector.broadcast %cst_14 : f32 to vector<32x1xf32>
    %47 = arith.addf %45, %46 : vector<32x1xf32>
    %cst_15 = arith.constant 5.000000e-01 : f32
    %48 = vector.broadcast %cst_15 : f32 to vector<32x1xf32>
    %49 = arith.mulf %48, %47 : vector<32x1xf32>
    %50 = vector.broadcast %49 : vector<32x1xf32> to vector<32x256xf32>
    %51 = arith.mulf %1, %50 : vector<32x256xf32>
    %cst_16 = arith.constant dense<0.000000e+00> : vector<256xf32>
    %52 = vector.multi_reduction <add>, %51, %cst_16 [0] : vector<32x256xf32> to vector<256xf32>
    %53 = vector.shape_cast %52 : vector<256xf32> to vector<1x256xf32>
    %cst_17 = arith.constant 3.200000e+01 : f32
    %54 = vector.broadcast %cst_17 : f32 to vector<1x256xf32>
    %55 = arith.divf %53, %54 : vector<1x256xf32>
    %cst_18 = arith.constant dense<0xFF800000> : vector<256xf32>
    %56 = vector.multi_reduction <maximumf>, %51, %cst_18 [0] : vector<32x256xf32> to vector<256xf32>
    %57 = vector.shape_cast %56 : vector<256xf32> to vector<1x256xf32>
    %cst_19 = arith.constant 0.000000e+00 : f32
    %58 = vector.broadcast %cst_19 : f32 to vector<2x128xf32>
    %c0_20 = arith.constant 0 : index
    %c0_21 = arith.constant 0 : index
    %59 = vector.load %arg7[%c0_20, %c0_21] : memref<2x512xf32, #tpu.memory_space<vmem>>, vector<2x128xf32>
    tpu.vector_store %arg7[%c0_20, %c0_21], %58 {strides = array<i32>} : memref<2x512xf32, #tpu.memory_space<vmem>>, vector<2x128xf32>,
    %c0_22 = arith.constant 0 : index
    %c384 = arith.constant 384 : index
    %60 = vector.load %arg7[%c0_22, %c384] : memref<2x512xf32, #tpu.memory_space<vmem>>, vector<2x128xf32>
    tpu.vector_store %arg7[%c0_22, %c384], %58 {strides = array<i32>} : memref<2x512xf32, #tpu.memory_space<vmem>>, vector<2x128xf32>,
    %c0_23 = arith.constant 0 : index
    %c128 = arith.constant 128 : index
    %61 = vector.load %arg7[%c0_23, %c128] : memref<2x512xf32, #tpu.memory_space<vmem>>, vector<1x256xf32>
    tpu.vector_store %arg7[%c0_23, %c128], %55 {strides = array<i32>} : memref<2x512xf32, #tpu.memory_space<vmem>>, vector<1x256xf32>,
    %c1 = arith.constant 1 : index
    %c128_24 = arith.constant 128 : index
    %62 = vector.load %arg7[%c1, %c128_24] : memref<2x512xf32, #tpu.memory_space<vmem>>, vector<1x256xf32>
    tpu.vector_store %arg7[%c1, %c128_24], %57 {strides = array<i32>} : memref<2x512xf32, #tpu.memory_space<vmem>>, vector<1x256xf32>,
    %c0_25 = arith.constant 0 : index
    %c0_26 = arith.constant 0 : index
    %63 = vector.load %arg4[%c0_25, %c0_26] : memref<1x256xi32, #tpu.memory_space<vmem>>, vector<1x256xi32>
    %cst_27 = arith.constant 0.000000e+00 : f32
    %64 = vector.broadcast %cst_27 : f32 to vector<1x256xf32>
    %cst_28 = arith.constant 0.000000e+00 : f32
    %65 = vector.broadcast %cst_28 : f32 to vector<1x256xf32>
    %c0_29 = arith.constant 0 : index
    %c77 = arith.constant 77 : index
    %66 = vector.load %arg7[%c0_29, %c77] : memref<2x512xf32, #tpu.memory_space<vmem>>, vector<1x256xf32>
    %c1_30 = arith.constant 1 : index
    %c77_31 = arith.constant 77 : index
    %67 = vector.load %arg7[%c1_30, %c77_31] : memref<2x512xf32, #tpu.memory_space<vmem>>, vector<1x256xf32>
    %c0_32 = arith.constant 0 : index
    %68 = memref.load %arg5[%c0_32] : memref<98xf32, #tpu.memory_space<smem>>
    %c49 = arith.constant 49 : index
    %69 = memref.load %arg5[%c49] : memref<98xf32, #tpu.memory_space<smem>>
    %70 = vector.broadcast %68 : f32 to vector<1x256xf32>
    %71 = arith.mulf %66, %70 : vector<1x256xf32>
    %72 = arith.addf %64, %71 : vector<1x256xf32>
    %73 = vector.broadcast %69 : f32 to vector<1x256xf32>
    %74 = arith.mulf %67, %73 : vector<1x256xf32>
    %75 = arith.addf %72, %74 : vector<1x256xf32>
    %c0_33 = arith.constant 0 : index
    %c93 = arith.constant 93 : index
    %76 = vector.load %arg7[%c0_33, %c93] : memref<2x512xf32, #tpu.memory_space<vmem>>, vector<1x256xf32>
    %c1_34 = arith.constant 1 : index
    %c93_35 = arith.constant 93 : index
    %77 = vector.load %arg7[%c1_34, %c93_35] : memref<2x512xf32, #tpu.memory_space<vmem>>, vector<1x256xf32>
    %c7 = arith.constant 7 : index
    %78 = memref.load %arg5[%c7] : memref<98xf32, #tpu.memory_space<smem>>
    %c56 = arith.constant 56 : index
    %79 = memref.load %arg5[%c56] : memref<98xf32, #tpu.memory_space<smem>>
    %80 = vector.broadcast %78 : f32 to vector<1x256xf32>
    %81 = arith.mulf %76, %80 : vector<1x256xf32>
    %82 = arith.addf %65, %81 : vector<1x256xf32>
    %83 = vector.broadcast %79 : f32 to vector<1x256xf32>
    %84 = arith.mulf %77, %83 : vector<1x256xf32>
    %85 = arith.addf %82, %84 : vector<1x256xf32>
    %c0_36 = arith.constant 0 : index
    %c109 = arith.constant 109 : index
    %86 = vector.load %arg7[%c0_36, %c109] : memref<2x512xf32, #tpu.memory_space<vmem>>, vector<1x256xf32>
    %c1_37 = arith.constant 1 : index
    %c109_38 = arith.constant 109 : index
    %87 = vector.load %arg7[%c1_37, %c109_38] : memref<2x512xf32, #tpu.memory_space<vmem>>, vector<1x256xf32>
    %c14 = arith.constant 14 : index
    %88 = memref.load %arg5[%c14] : memref<98xf32, #tpu.memory_space<smem>>
    %c63 = arith.constant 63 : index
    %89 = memref.load %arg5[%c63] : memref<98xf32, #tpu.memory_space<smem>>
    %90 = vector.broadcast %88 : f32 to vector<1x256xf32>
    %91 = arith.mulf %86, %90 : vector<1x256xf32>
    %92 = arith.addf %75, %91 : vector<1x256xf32>
    %93 = vector.broadcast %89 : f32 to vector<1x256xf32>
    %94 = arith.mulf %87, %93 : vector<1x256xf32>
    %95 = arith.addf %92, %94 : vector<1x256xf32>
    %c0_39 = arith.constant 0 : index
    %c125 = arith.constant 125 : index
    %96 = vector.load %arg7[%c0_39, %c125] : memref<2x512xf32, #tpu.memory_space<vmem>>, vector<1x256xf32>
    %c1_40 = arith.constant 1 : index
    %c125_41 = arith.constant 125 : index
    %97 = vector.load %arg7[%c1_40, %c125_41] : memref<2x512xf32, #tpu.memory_space<vmem>>, vector<1x256xf32>
    %c21 = arith.constant 21 : index
    %98 = memref.load %arg5[%c21] : memref<98xf32, #tpu.memory_space<smem>>
    %c70 = arith.constant 70 : index
    %99 = memref.load %arg5[%c70] : memref<98xf32, #tpu.memory_space<smem>>
    %100 = vector.broadcast %98 : f32 to vector<1x256xf32>
    %101 = arith.mulf %96, %100 : vector<1x256xf32>
    %102 = arith.addf %85, %101 : vector<1x256xf32>
    %103 = vector.broadcast %99 : f32 to vector<1x256xf32>
    %104 = arith.mulf %97, %103 : vector<1x256xf32>
    %105 = arith.addf %102, %104 : vector<1x256xf32>
    %c0_42 = arith.constant 0 : index
    %c141 = arith.constant 141 : index
    %106 = vector.load %arg7[%c0_42, %c141] : memref<2x512xf32, #tpu.memory_space<vmem>>, vector<1x256xf32>
    %c1_43 = arith.constant 1 : index
    %c141_44 = arith.constant 141 : index
    %107 = vector.load %arg7[%c1_43, %c141_44] : memref<2x512xf32, #tpu.memory_space<vmem>>, vector<1x256xf32>
    %c28 = arith.constant 28 : index
    %108 = memref.load %arg5[%c28] : memref<98xf32, #tpu.memory_space<smem>>
    %c77_45 = arith.constant 77 : index
    %109 = memref.load %arg5[%c77_45] : memref<98xf32, #tpu.memory_space<smem>>
    %110 = vector.broadcast %108 : f32 to vector<1x256xf32>
    %111 = arith.mulf %106, %110 : vector<1x256xf32>
    %112 = arith.addf %95, %111 : vector<1x256xf32>
    %113 = vector.broadcast %109 : f32 to vector<1x256xf32>
    %114 = arith.mulf %107, %113 : vector<1x256xf32>
    %115 = arith.addf %112, %114 : vector<1x256xf32>
    %c0_46 = arith.constant 0 : index
    %c157 = arith.constant 157 : index
    %116 = vector.load %arg7[%c0_46, %c157] : memref<2x512xf32, #tpu.memory_space<vmem>>, vector<1x256xf32>
    %c1_47 = arith.constant 1 : index
    %c157_48 = arith.constant 157 : index
    %117 = vector.load %arg7[%c1_47, %c157_48] : memref<2x512xf32, #tpu.memory_space<vmem>>, vector<1x256xf32>
    %c35 = arith.constant 35 : index
    %118 = memref.load %arg5[%c35] : memref<98xf32, #tpu.memory_space<smem>>
    %c84 = arith.constant 84 : index
    %119 = memref.load %arg5[%c84] : memref<98xf32, #tpu.memory_space<smem>>
    %120 = vector.broadcast %118 : f32 to vector<1x256xf32>
    %121 = arith.mulf %116, %120 : vector<1x256xf32>
    %122 = arith.addf %105, %121 : vector<1x256xf32>
    %123 = vector.broadcast %119 : f32 to vector<1x256xf32>
    %124 = arith.mulf %117, %123 : vector<1x256xf32>
    %125 = arith.addf %122, %124 : vector<1x256xf32>
    %c0_49 = arith.constant 0 : index
    %c173 = arith.constant 173 : index
    %126 = vector.load %arg7[%c0_49, %c173] : memref<2x512xf32, #tpu.memory_space<vmem>>, vector<1x256xf32>
    %c1_50 = arith.constant 1 : index
    %c173_51 = arith.constant 173 : index
    %127 = vector.load %arg7[%c1_50, %c173_51] : memref<2x512xf32, #tpu.memory_space<vmem>>, vector<1x256xf32>
    %c42 = arith.constant 42 : index
    %128 = memref.load %arg5[%c42] : memref<98xf32, #tpu.memory_space<smem>>
    %c91 = arith.constant 91 : index
    %129 = memref.load %arg5[%c91] : memref<98xf32, #tpu.memory_space<smem>>
    %130 = vector.broadcast %128 : f32 to vector<1x256xf32>
    %131 = arith.mulf %126, %130 : vector<1x256xf32>
    %132 = arith.addf %115, %131 : vector<1x256xf32>
    %133 = vector.broadcast %129 : f32 to vector<1x256xf32>
    %134 = arith.mulf %127, %133 : vector<1x256xf32>
    %135 = arith.addf %132, %134 : vector<1x256xf32>
    %136 = arith.addf %135, %125 : vector<1x256xf32>
    %c-3_i32 = arith.constant -3 : i32
    %137 = vector.broadcast %c-3_i32 : i32 to vector<1x256xi32>
    %138 = arith.addi %63, %137 : vector<1x256xi32>
    %c0_i32_52 = arith.constant 0 : i32
    %139 = vector.broadcast %c0_i32_52 : i32 to vector<1x256xi32>
    %140 = arith.cmpi sge, %138, %139 : vector<1x256xi32>
    %c-3_i32_53 = arith.constant -3 : i32
    %141 = vector.broadcast %c-3_i32_53 : i32 to vector<1x256xi32>
    %142 = arith.addi %63, %141 : vector<1x256xi32>
    %c16_i32 = arith.constant 16 : i32
    %143 = vector.broadcast %c16_i32 : i32 to vector<1x256xi32>
    %144 = arith.cmpi slt, %142, %143 : vector<1x256xi32>
    %145 = arith.andi %140, %144 : vector<1x256xi1>
    %cst_54 = arith.constant 0.000000e+00 : f32
    %146 = vector.broadcast %cst_54 : f32 to vector<1x256xf32>
    %147 = arith.select %145, %136, %146 : vector<1x256xi1>, vector<1x256xf32>
    %cst_55 = arith.constant 0.000000e+00 : f32
    %148 = vector.broadcast %cst_55 : f32 to vector<1x256xf32>
    %cst_56 = arith.constant 0.000000e+00 : f32
    %149 = vector.broadcast %cst_56 : f32 to vector<1x256xf32>
    %c0_57 = arith.constant 0 : index
    %c78 = arith.constant 78 : index
    %150 = vector.load %arg7[%c0_57, %c78] : memref<2x512xf32, #tpu.memory_space<vmem>>, vector<1x256xf32>
    %c1_58 = arith.constant 1 : index
    %c78_59 = arith.constant 78 : index
    %151 = vector.load %arg7[%c1_58, %c78_59] : memref<2x512xf32, #tpu.memory_space<vmem>>, vector<1x256xf32>
    %c1_60 = arith.constant 1 : index
    %152 = memref.load %arg5[%c1_60] : memref<98xf32, #tpu.memory_space<smem>>
    %c50 = arith.constant 50 : index
    %153 = memref.load %arg5[%c50] : memref<98xf32, #tpu.memory_space<smem>>
    %154 = vector.broadcast %152 : f32 to vector<1x256xf32>
    %155 = arith.mulf %150, %154 : vector<1x256xf32>
    %156 = arith.addf %148, %155 : vector<1x256xf32>
    %157 = vector.broadcast %153 : f32 to vector<1x256xf32>
    %158 = arith.mulf %151, %157 : vector<1x256xf32>
    %159 = arith.addf %156, %158 : vector<1x256xf32>
    %c0_61 = arith.constant 0 : index
    %c94 = arith.constant 94 : index
    %160 = vector.load %arg7[%c0_61, %c94] : memref<2x512xf32, #tpu.memory_space<vmem>>, vector<1x256xf32>
    %c1_62 = arith.constant 1 : index
    %c94_63 = arith.constant 94 : index
    %161 = vector.load %arg7[%c1_62, %c94_63] : memref<2x512xf32, #tpu.memory_space<vmem>>, vector<1x256xf32>
    %c8 = arith.constant 8 : index
    %162 = memref.load %arg5[%c8] : memref<98xf32, #tpu.memory_space<smem>>
    %c57 = arith.constant 57 : index
    %163 = memref.load %arg5[%c57] : memref<98xf32, #tpu.memory_space<smem>>
    %164 = vector.broadcast %162 : f32 to vector<1x256xf32>
    %165 = arith.mulf %160, %164 : vector<1x256xf32>
    %166 = arith.addf %149, %165 : vector<1x256xf32>
    %167 = vector.broadcast %163 : f32 to vector<1x256xf32>
    %168 = arith.mulf %161, %167 : vector<1x256xf32>
    %169 = arith.addf %166, %168 : vector<1x256xf32>
    %c0_64 = arith.constant 0 : index
    %c110 = arith.constant 110 : index
    %170 = vector.load %arg7[%c0_64, %c110] : memref<2x512xf32, #tpu.memory_space<vmem>>, vector<1x256xf32>
    %c1_65 = arith.constant 1 : index
    %c110_66 = arith.constant 110 : index
    %171 = vector.load %arg7[%c1_65, %c110_66] : memref<2x512xf32, #tpu.memory_space<vmem>>, vector<1x256xf32>
    %c15 = arith.constant 15 : index
    %172 = memref.load %arg5[%c15] : memref<98xf32, #tpu.memory_space<smem>>
    %c64 = arith.constant 64 : index
    %173 = memref.load %arg5[%c64] : memref<98xf32, #tpu.memory_space<smem>>
    %174 = vector.broadcast %172 : f32 to vector<1x256xf32>
    %175 = arith.mulf %170, %174 : vector<1x256xf32>
    %176 = arith.addf %159, %175 : vector<1x256xf32>
    %177 = vector.broadcast %173 : f32 to vector<1x256xf32>
    %178 = arith.mulf %171, %177 : vector<1x256xf32>
    %179 = arith.addf %176, %178 : vector<1x256xf32>
    %c0_67 = arith.constant 0 : index
    %c126 = arith.constant 126 : index
    %180 = vector.load %arg7[%c0_67, %c126] : memref<2x512xf32, #tpu.memory_space<vmem>>, vector<1x256xf32>
    %c1_68 = arith.constant 1 : index
    %c126_69 = arith.constant 126 : index
    %181 = vector.load %arg7[%c1_68, %c126_69] : memref<2x512xf32, #tpu.memory_space<vmem>>, vector<1x256xf32>
    %c22 = arith.constant 22 : index
    %182 = memref.load %arg5[%c22] : memref<98xf32, #tpu.memory_space<smem>>
    %c71 = arith.constant 71 : index
    %183 = memref.load %arg5[%c71] : memref<98xf32, #tpu.memory_space<smem>>
    %184 = vector.broadcast %182 : f32 to vector<1x256xf32>
    %185 = arith.mulf %180, %184 : vector<1x256xf32>
    %186 = arith.addf %169, %185 : vector<1x256xf32>
    %187 = vector.broadcast %183 : f32 to vector<1x256xf32>
    %188 = arith.mulf %181, %187 : vector<1x256xf32>
    %189 = arith.addf %186, %188 : vector<1x256xf32>
    %c0_70 = arith.constant 0 : index
    %c142 = arith.constant 142 : index
    %190 = vector.load %arg7[%c0_70, %c142] : memref<2x512xf32, #tpu.memory_space<vmem>>, vector<1x256xf32>
    %c1_71 = arith.constant 1 : index
    %c142_72 = arith.constant 142 : index
    %191 = vector.load %arg7[%c1_71, %c142_72] : memref<2x512xf32, #tpu.memory_space<vmem>>, vector<1x256xf32>
    %c29 = arith.constant 29 : index
    %192 = memref.load %arg5[%c29] : memref<98xf32, #tpu.memory_space<smem>>
    %c78_73 = arith.constant 78 : index
    %193 = memref.load %arg5[%c78_73] : memref<98xf32, #tpu.memory_space<smem>>
    %194 = vector.broadcast %192 : f32 to vector<1x256xf32>
    %195 = arith.mulf %190, %194 : vector<1x256xf32>
    %196 = arith.addf %179, %195 : vector<1x256xf32>
    %197 = vector.broadcast %193 : f32 to vector<1x256xf32>
    %198 = arith.mulf %191, %197 : vector<1x256xf32>
    %199 = arith.addf %196, %198 : vector<1x256xf32>
    %c0_74 = arith.constant 0 : index
    %c158 = arith.constant 158 : index
    %200 = vector.load %arg7[%c0_74, %c158] : memref<2x512xf32, #tpu.memory_space<vmem>>, vector<1x256xf32>
    %c1_75 = arith.constant 1 : index
    %c158_76 = arith.constant 158 : index
    %201 = vector.load %arg7[%c1_75, %c158_76] : memref<2x512xf32, #tpu.memory_space<vmem>>, vector<1x256xf32>
    %c36 = arith.constant 36 : index
    %202 = memref.load %arg5[%c36] : memref<98xf32, #tpu.memory_space<smem>>
    %c85 = arith.constant 85 : index
    %203 = memref.load %arg5[%c85] : memref<98xf32, #tpu.memory_space<smem>>
    %204 = vector.broadcast %202 : f32 to vector<1x256xf32>
    %205 = arith.mulf %200, %204 : vector<1x256xf32>
    %206 = arith.addf %189, %205 : vector<1x256xf32>
    %207 = vector.broadcast %203 : f32 to vector<1x256xf32>
    %208 = arith.mulf %201, %207 : vector<1x256xf32>
    %209 = arith.addf %206, %208 : vector<1x256xf32>
    %c0_77 = arith.constant 0 : index
    %c174 = arith.constant 174 : index
    %210 = vector.load %arg7[%c0_77, %c174] : memref<2x512xf32, #tpu.memory_space<vmem>>, vector<1x256xf32>
    %c1_78 = arith.constant 1 : index
    %c174_79 = arith.constant 174 : index
    %211 = vector.load %arg7[%c1_78, %c174_79] : memref<2x512xf32, #tpu.memory_space<vmem>>, vector<1x256xf32>
    %c43 = arith.constant 43 : index
    %212 = memref.load %arg5[%c43] : memref<98xf32, #tpu.memory_space<smem>>
    %c92 = arith.constant 92 : index
    %213 = memref.load %arg5[%c92] : memref<98xf32, #tpu.memory_space<smem>>
    %214 = vector.broadcast %212 : f32 to vector<1x256xf32>
    %215 = arith.mulf %210, %214 : vector<1x256xf32>
    %216 = arith.addf %199, %215 : vector<1x256xf32>
    %217 = vector.broadcast %213 : f32 to vector<1x256xf32>
    %218 = arith.mulf %211, %217 : vector<1x256xf32>
    %219 = arith.addf %216, %218 : vector<1x256xf32>
    %220 = arith.addf %219, %209 : vector<1x256xf32>
    %c-2_i32 = arith.constant -2 : i32
    %221 = vector.broadcast %c-2_i32 : i32 to vector<1x256xi32>
    %222 = arith.addi %63, %221 : vector<1x256xi32>
    %c0_i32_80 = arith.constant 0 : i32
    %223 = vector.broadcast %c0_i32_80 : i32 to vector<1x256xi32>
    %224 = arith.cmpi sge, %222, %223 : vector<1x256xi32>
    %c-2_i32_81 = arith.constant -2 : i32
    %225 = vector.broadcast %c-2_i32_81 : i32 to vector<1x256xi32>
    %226 = arith.addi %63, %225 : vector<1x256xi32>
    %c16_i32_82 = arith.constant 16 : i32
    %227 = vector.broadcast %c16_i32_82 : i32 to vector<1x256xi32>
    %228 = arith.cmpi slt, %226, %227 : vector<1x256xi32>
    %229 = arith.andi %224, %228 : vector<1x256xi1>
    %cst_83 = arith.constant 0.000000e+00 : f32
    %230 = vector.broadcast %cst_83 : f32 to vector<1x256xf32>
    %231 = arith.select %229, %220, %230 : vector<1x256xi1>, vector<1x256xf32>
    %cst_84 = arith.constant 0.000000e+00 : f32
    %232 = vector.broadcast %cst_84 : f32 to vector<1x256xf32>
    %cst_85 = arith.constant 0.000000e+00 : f32
    %233 = vector.broadcast %cst_85 : f32 to vector<1x256xf32>
    %c0_86 = arith.constant 0 : index
    %c79 = arith.constant 79 : index
    %234 = vector.load %arg7[%c0_86, %c79] : memref<2x512xf32, #tpu.memory_space<vmem>>, vector<1x256xf32>
    %c1_87 = arith.constant 1 : index
    %c79_88 = arith.constant 79 : index
    %235 = vector.load %arg7[%c1_87, %c79_88] : memref<2x512xf32, #tpu.memory_space<vmem>>, vector<1x256xf32>
    %c2 = arith.constant 2 : index
    %236 = memref.load %arg5[%c2] : memref<98xf32, #tpu.memory_space<smem>>
    %c51 = arith.constant 51 : index
    %237 = memref.load %arg5[%c51] : memref<98xf32, #tpu.memory_space<smem>>
    %238 = vector.broadcast %236 : f32 to vector<1x256xf32>
    %239 = arith.mulf %234, %238 : vector<1x256xf32>
    %240 = arith.addf %232, %239 : vector<1x256xf32>
    %241 = vector.broadcast %237 : f32 to vector<1x256xf32>
    %242 = arith.mulf %235, %241 : vector<1x256xf32>
    %243 = arith.addf %240, %242 : vector<1x256xf32>
    %c0_89 = arith.constant 0 : index
    %c95 = arith.constant 95 : index
    %244 = vector.load %arg7[%c0_89, %c95] : memref<2x512xf32, #tpu.memory_space<vmem>>, vector<1x256xf32>
    %c1_90 = arith.constant 1 : index
    %c95_91 = arith.constant 95 : index
    %245 = vector.load %arg7[%c1_90, %c95_91] : memref<2x512xf32, #tpu.memory_space<vmem>>, vector<1x256xf32>
    %c9 = arith.constant 9 : index
    %246 = memref.load %arg5[%c9] : memref<98xf32, #tpu.memory_space<smem>>
    %c58 = arith.constant 58 : index
    %247 = memref.load %arg5[%c58] : memref<98xf32, #tpu.memory_space<smem>>
    %248 = vector.broadcast %246 : f32 to vector<1x256xf32>
    %249 = arith.mulf %244, %248 : vector<1x256xf32>
    %250 = arith.addf %233, %249 : vector<1x256xf32>
    %251 = vector.broadcast %247 : f32 to vector<1x256xf32>
    %252 = arith.mulf %245, %251 : vector<1x256xf32>
    %253 = arith.addf %250, %252 : vector<1x256xf32>
    %c0_92 = arith.constant 0 : index
    %c111 = arith.constant 111 : index
    %254 = vector.load %arg7[%c0_92, %c111] : memref<2x512xf32, #tpu.memory_space<vmem>>, vector<1x256xf32>
    %c1_93 = arith.constant 1 : index
    %c111_94 = arith.constant 111 : index
    %255 = vector.load %arg7[%c1_93, %c111_94] : memref<2x512xf32, #tpu.memory_space<vmem>>, vector<1x256xf32>
    %c16 = arith.constant 16 : index
    %256 = memref.load %arg5[%c16] : memref<98xf32, #tpu.memory_space<smem>>
    %c65 = arith.constant 65 : index
    %257 = memref.load %arg5[%c65] : memref<98xf32, #tpu.memory_space<smem>>
    %258 = vector.broadcast %256 : f32 to vector<1x256xf32>
    %259 = arith.mulf %254, %258 : vector<1x256xf32>
    %260 = arith.addf %243, %259 : vector<1x256xf32>
    %261 = vector.broadcast %257 : f32 to vector<1x256xf32>
    %262 = arith.mulf %255, %261 : vector<1x256xf32>
    %263 = arith.addf %260, %262 : vector<1x256xf32>
    %c0_95 = arith.constant 0 : index
    %c127 = arith.constant 127 : index
    %264 = vector.load %arg7[%c0_95, %c127] : memref<2x512xf32, #tpu.memory_space<vmem>>, vector<1x256xf32>
    %c1_96 = arith.constant 1 : index
    %c127_97 = arith.constant 127 : index
    %265 = vector.load %arg7[%c1_96, %c127_97] : memref<2x512xf32, #tpu.memory_space<vmem>>, vector<1x256xf32>
    %c23 = arith.constant 23 : index
    %266 = memref.load %arg5[%c23] : memref<98xf32, #tpu.memory_space<smem>>
    %c72 = arith.constant 72 : index
    %267 = memref.load %arg5[%c72] : memref<98xf32, #tpu.memory_space<smem>>
    %268 = vector.broadcast %266 : f32 to vector<1x256xf32>
    %269 = arith.mulf %264, %268 : vector<1x256xf32>
    %270 = arith.addf %253, %269 : vector<1x256xf32>
    %271 = vector.broadcast %267 : f32 to vector<1x256xf32>
    %272 = arith.mulf %265, %271 : vector<1x256xf32>
    %273 = arith.addf %270, %272 : vector<1x256xf32>
    %c0_98 = arith.constant 0 : index
    %c143 = arith.constant 143 : index
    %274 = vector.load %arg7[%c0_98, %c143] : memref<2x512xf32, #tpu.memory_space<vmem>>, vector<1x256xf32>
    %c1_99 = arith.constant 1 : index
    %c143_100 = arith.constant 143 : index
    %275 = vector.load %arg7[%c1_99, %c143_100] : memref<2x512xf32, #tpu.memory_space<vmem>>, vector<1x256xf32>
    %c30 = arith.constant 30 : index
    %276 = memref.load %arg5[%c30] : memref<98xf32, #tpu.memory_space<smem>>
    %c79_101 = arith.constant 79 : index
    %277 = memref.load %arg5[%c79_101] : memref<98xf32, #tpu.memory_space<smem>>
    %278 = vector.broadcast %276 : f32 to vector<1x256xf32>
    %279 = arith.mulf %274, %278 : vector<1x256xf32>
    %280 = arith.addf %263, %279 : vector<1x256xf32>
    %281 = vector.broadcast %277 : f32 to vector<1x256xf32>
    %282 = arith.mulf %275, %281 : vector<1x256xf32>
    %283 = arith.addf %280, %282 : vector<1x256xf32>
    %c0_102 = arith.constant 0 : index
    %c159 = arith.constant 159 : index
    %284 = vector.load %arg7[%c0_102, %c159] : memref<2x512xf32, #tpu.memory_space<vmem>>, vector<1x256xf32>
    %c1_103 = arith.constant 1 : index
    %c159_104 = arith.constant 159 : index
    %285 = vector.load %arg7[%c1_103, %c159_104] : memref<2x512xf32, #tpu.memory_space<vmem>>, vector<1x256xf32>
    %c37 = arith.constant 37 : index
    %286 = memref.load %arg5[%c37] : memref<98xf32, #tpu.memory_space<smem>>
    %c86 = arith.constant 86 : index
    %287 = memref.load %arg5[%c86] : memref<98xf32, #tpu.memory_space<smem>>
    %288 = vector.broadcast %286 : f32 to vector<1x256xf32>
    %289 = arith.mulf %284, %288 : vector<1x256xf32>
    %290 = arith.addf %273, %289 : vector<1x256xf32>
    %291 = vector.broadcast %287 : f32 to vector<1x256xf32>
    %292 = arith.mulf %285, %291 : vector<1x256xf32>
    %293 = arith.addf %290, %292 : vector<1x256xf32>
    %c0_105 = arith.constant 0 : index
    %c175 = arith.constant 175 : index
    %294 = vector.load %arg7[%c0_105, %c175] : memref<2x512xf32, #tpu.memory_space<vmem>>, vector<1x256xf32>
    %c1_106 = arith.constant 1 : index
    %c175_107 = arith.constant 175 : index
    %295 = vector.load %arg7[%c1_106, %c175_107] : memref<2x512xf32, #tpu.memory_space<vmem>>, vector<1x256xf32>
    %c44 = arith.constant 44 : index
    %296 = memref.load %arg5[%c44] : memref<98xf32, #tpu.memory_space<smem>>
    %c93_108 = arith.constant 93 : index
    %297 = memref.load %arg5[%c93_108] : memref<98xf32, #tpu.memory_space<smem>>
    %298 = vector.broadcast %296 : f32 to vector<1x256xf32>
    %299 = arith.mulf %294, %298 : vector<1x256xf32>
    %300 = arith.addf %283, %299 : vector<1x256xf32>
    %301 = vector.broadcast %297 : f32 to vector<1x256xf32>
    %302 = arith.mulf %295, %301 : vector<1x256xf32>
    %303 = arith.addf %300, %302 : vector<1x256xf32>
    %304 = arith.addf %303, %293 : vector<1x256xf32>
    %c-1_i32 = arith.constant -1 : i32
    %305 = vector.broadcast %c-1_i32 : i32 to vector<1x256xi32>
    %306 = arith.addi %63, %305 : vector<1x256xi32>
    %c0_i32_109 = arith.constant 0 : i32
    %307 = vector.broadcast %c0_i32_109 : i32 to vector<1x256xi32>
    %308 = arith.cmpi sge, %306, %307 : vector<1x256xi32>
    %c-1_i32_110 = arith.constant -1 : i32
    %309 = vector.broadcast %c-1_i32_110 : i32 to vector<1x256xi32>
    %310 = arith.addi %63, %309 : vector<1x256xi32>
    %c16_i32_111 = arith.constant 16 : i32
    %311 = vector.broadcast %c16_i32_111 : i32 to vector<1x256xi32>
    %312 = arith.cmpi slt, %310, %311 : vector<1x256xi32>
    %313 = arith.andi %308, %312 : vector<1x256xi1>
    %cst_112 = arith.constant 0.000000e+00 : f32
    %314 = vector.broadcast %cst_112 : f32 to vector<1x256xf32>
    %315 = arith.select %313, %304, %314 : vector<1x256xi1>, vector<1x256xf32>
    %cst_113 = arith.constant 0.000000e+00 : f32
    %316 = vector.broadcast %cst_113 : f32 to vector<1x256xf32>
    %cst_114 = arith.constant 0.000000e+00 : f32
    %317 = vector.broadcast %cst_114 : f32 to vector<1x256xf32>
    %c0_115 = arith.constant 0 : index
    %c80 = arith.constant 80 : index
    %318 = vector.load %arg7[%c0_115, %c80] : memref<2x512xf32, #tpu.memory_space<vmem>>, vector<1x256xf32>
    %c1_116 = arith.constant 1 : index
    %c80_117 = arith.constant 80 : index
    %319 = vector.load %arg7[%c1_116, %c80_117] : memref<2x512xf32, #tpu.memory_space<vmem>>, vector<1x256xf32>
    %c3 = arith.constant 3 : index
    %320 = memref.load %arg5[%c3] : memref<98xf32, #tpu.memory_space<smem>>
    %c52 = arith.constant 52 : index
    %321 = memref.load %arg5[%c52] : memref<98xf32, #tpu.memory_space<smem>>
    %322 = vector.broadcast %320 : f32 to vector<1x256xf32>
    %323 = arith.mulf %318, %322 : vector<1x256xf32>
    %324 = arith.addf %316, %323 : vector<1x256xf32>
    %325 = vector.broadcast %321 : f32 to vector<1x256xf32>
    %326 = arith.mulf %319, %325 : vector<1x256xf32>
    %327 = arith.addf %324, %326 : vector<1x256xf32>
    %c0_118 = arith.constant 0 : index
    %c96 = arith.constant 96 : index
    %328 = vector.load %arg7[%c0_118, %c96] : memref<2x512xf32, #tpu.memory_space<vmem>>, vector<1x256xf32>
    %c1_119 = arith.constant 1 : index
    %c96_120 = arith.constant 96 : index
    %329 = vector.load %arg7[%c1_119, %c96_120] : memref<2x512xf32, #tpu.memory_space<vmem>>, vector<1x256xf32>
    %c10 = arith.constant 10 : index
    %330 = memref.load %arg5[%c10] : memref<98xf32, #tpu.memory_space<smem>>
    %c59 = arith.constant 59 : index
    %331 = memref.load %arg5[%c59] : memref<98xf32, #tpu.memory_space<smem>>
    %332 = vector.broadcast %330 : f32 to vector<1x256xf32>
    %333 = arith.mulf %328, %332 : vector<1x256xf32>
    %334 = arith.addf %317, %333 : vector<1x256xf32>
    %335 = vector.broadcast %331 : f32 to vector<1x256xf32>
    %336 = arith.mulf %329, %335 : vector<1x256xf32>
    %337 = arith.addf %334, %336 : vector<1x256xf32>
    %c0_121 = arith.constant 0 : index
    %c112 = arith.constant 112 : index
    %338 = vector.load %arg7[%c0_121, %c112] : memref<2x512xf32, #tpu.memory_space<vmem>>, vector<1x256xf32>
    %c1_122 = arith.constant 1 : index
    %c112_123 = arith.constant 112 : index
    %339 = vector.load %arg7[%c1_122, %c112_123] : memref<2x512xf32, #tpu.memory_space<vmem>>, vector<1x256xf32>
    %c17 = arith.constant 17 : index
    %340 = memref.load %arg5[%c17] : memref<98xf32, #tpu.memory_space<smem>>
    %c66 = arith.constant 66 : index
    %341 = memref.load %arg5[%c66] : memref<98xf32, #tpu.memory_space<smem>>
    %342 = vector.broadcast %340 : f32 to vector<1x256xf32>
    %343 = arith.mulf %338, %342 : vector<1x256xf32>
    %344 = arith.addf %327, %343 : vector<1x256xf32>
    %345 = vector.broadcast %341 : f32 to vector<1x256xf32>
    %346 = arith.mulf %339, %345 : vector<1x256xf32>
    %347 = arith.addf %344, %346 : vector<1x256xf32>
    %c0_124 = arith.constant 0 : index
    %c128_125 = arith.constant 128 : index
    %348 = vector.load %arg7[%c0_124, %c128_125] : memref<2x512xf32, #tpu.memory_space<vmem>>, vector<1x256xf32>
    %c1_126 = arith.constant 1 : index
    %c128_127 = arith.constant 128 : index
    %349 = vector.load %arg7[%c1_126, %c128_127] : memref<2x512xf32, #tpu.memory_space<vmem>>, vector<1x256xf32>
    %c24 = arith.constant 24 : index
    %350 = memref.load %arg5[%c24] : memref<98xf32, #tpu.memory_space<smem>>
    %c73 = arith.constant 73 : index
    %351 = memref.load %arg5[%c73] : memref<98xf32, #tpu.memory_space<smem>>
    %352 = vector.broadcast %350 : f32 to vector<1x256xf32>
    %353 = arith.mulf %348, %352 : vector<1x256xf32>
    %354 = arith.addf %337, %353 : vector<1x256xf32>
    %355 = vector.broadcast %351 : f32 to vector<1x256xf32>
    %356 = arith.mulf %349, %355 : vector<1x256xf32>
    %357 = arith.addf %354, %356 : vector<1x256xf32>
    %c0_128 = arith.constant 0 : index
    %c144 = arith.constant 144 : index
    %358 = vector.load %arg7[%c0_128, %c144] : memref<2x512xf32, #tpu.memory_space<vmem>>, vector<1x256xf32>
    %c1_129 = arith.constant 1 : index
    %c144_130 = arith.constant 144 : index
    %359 = vector.load %arg7[%c1_129, %c144_130] : memref<2x512xf32, #tpu.memory_space<vmem>>, vector<1x256xf32>
    %c31 = arith.constant 31 : index
    %360 = memref.load %arg5[%c31] : memref<98xf32, #tpu.memory_space<smem>>
    %c80_131 = arith.constant 80 : index
    %361 = memref.load %arg5[%c80_131] : memref<98xf32, #tpu.memory_space<smem>>
    %362 = vector.broadcast %360 : f32 to vector<1x256xf32>
    %363 = arith.mulf %358, %362 : vector<1x256xf32>
    %364 = arith.addf %347, %363 : vector<1x256xf32>
    %365 = vector.broadcast %361 : f32 to vector<1x256xf32>
    %366 = arith.mulf %359, %365 : vector<1x256xf32>
    %367 = arith.addf %364, %366 : vector<1x256xf32>
    %c0_132 = arith.constant 0 : index
    %c160 = arith.constant 160 : index
    %368 = vector.load %arg7[%c0_132, %c160] : memref<2x512xf32, #tpu.memory_space<vmem>>, vector<1x256xf32>
    %c1_133 = arith.constant 1 : index
    %c160_134 = arith.constant 160 : index
    %369 = vector.load %arg7[%c1_133, %c160_134] : memref<2x512xf32, #tpu.memory_space<vmem>>, vector<1x256xf32>
    %c38 = arith.constant 38 : index
    %370 = memref.load %arg5[%c38] : memref<98xf32, #tpu.memory_space<smem>>
    %c87 = arith.constant 87 : index
    %371 = memref.load %arg5[%c87] : memref<98xf32, #tpu.memory_space<smem>>
    %372 = vector.broadcast %370 : f32 to vector<1x256xf32>
    %373 = arith.mulf %368, %372 : vector<1x256xf32>
    %374 = arith.addf %357, %373 : vector<1x256xf32>
    %375 = vector.broadcast %371 : f32 to vector<1x256xf32>
    %376 = arith.mulf %369, %375 : vector<1x256xf32>
    %377 = arith.addf %374, %376 : vector<1x256xf32>
    %c0_135 = arith.constant 0 : index
    %c176 = arith.constant 176 : index
    %378 = vector.load %arg7[%c0_135, %c176] : memref<2x512xf32, #tpu.memory_space<vmem>>, vector<1x256xf32>
    %c1_136 = arith.constant 1 : index
    %c176_137 = arith.constant 176 : index
    %379 = vector.load %arg7[%c1_136, %c176_137] : memref<2x512xf32, #tpu.memory_space<vmem>>, vector<1x256xf32>
    %c45 = arith.constant 45 : index
    %380 = memref.load %arg5[%c45] : memref<98xf32, #tpu.memory_space<smem>>
    %c94_138 = arith.constant 94 : index
    %381 = memref.load %arg5[%c94_138] : memref<98xf32, #tpu.memory_space<smem>>
    %382 = vector.broadcast %380 : f32 to vector<1x256xf32>
    %383 = arith.mulf %378, %382 : vector<1x256xf32>
    %384 = arith.addf %367, %383 : vector<1x256xf32>
    %385 = vector.broadcast %381 : f32 to vector<1x256xf32>
    %386 = arith.mulf %379, %385 : vector<1x256xf32>
    %387 = arith.addf %384, %386 : vector<1x256xf32>
    %388 = arith.addf %387, %377 : vector<1x256xf32>
    %cst_139 = arith.constant 0.000000e+00 : f32
    %389 = vector.broadcast %cst_139 : f32 to vector<1x256xf32>
    %cst_140 = arith.constant 0.000000e+00 : f32
    %390 = vector.broadcast %cst_140 : f32 to vector<1x256xf32>
    %c0_141 = arith.constant 0 : index
    %c81 = arith.constant 81 : index
    %391 = vector.load %arg7[%c0_141, %c81] : memref<2x512xf32, #tpu.memory_space<vmem>>, vector<1x256xf32>
    %c1_142 = arith.constant 1 : index
    %c81_143 = arith.constant 81 : index
    %392 = vector.load %arg7[%c1_142, %c81_143] : memref<2x512xf32, #tpu.memory_space<vmem>>, vector<1x256xf32>
    %c4 = arith.constant 4 : index
    %393 = memref.load %arg5[%c4] : memref<98xf32, #tpu.memory_space<smem>>
    %c53 = arith.constant 53 : index
    %394 = memref.load %arg5[%c53] : memref<98xf32, #tpu.memory_space<smem>>
    %395 = vector.broadcast %393 : f32 to vector<1x256xf32>
    %396 = arith.mulf %391, %395 : vector<1x256xf32>
    %397 = arith.addf %389, %396 : vector<1x256xf32>
    %398 = vector.broadcast %394 : f32 to vector<1x256xf32>
    %399 = arith.mulf %392, %398 : vector<1x256xf32>
    %400 = arith.addf %397, %399 : vector<1x256xf32>
    %c0_144 = arith.constant 0 : index
    %c97 = arith.constant 97 : index
    %401 = vector.load %arg7[%c0_144, %c97] : memref<2x512xf32, #tpu.memory_space<vmem>>, vector<1x256xf32>
    %c1_145 = arith.constant 1 : index
    %c97_146 = arith.constant 97 : index
    %402 = vector.load %arg7[%c1_145, %c97_146] : memref<2x512xf32, #tpu.memory_space<vmem>>, vector<1x256xf32>
    %c11 = arith.constant 11 : index
    %403 = memref.load %arg5[%c11] : memref<98xf32, #tpu.memory_space<smem>>
    %c60 = arith.constant 60 : index
    %404 = memref.load %arg5[%c60] : memref<98xf32, #tpu.memory_space<smem>>
    %405 = vector.broadcast %403 : f32 to vector<1x256xf32>
    %406 = arith.mulf %401, %405 : vector<1x256xf32>
    %407 = arith.addf %390, %406 : vector<1x256xf32>
    %408 = vector.broadcast %404 : f32 to vector<1x256xf32>
    %409 = arith.mulf %402, %408 : vector<1x256xf32>
    %410 = arith.addf %407, %409 : vector<1x256xf32>
    %c0_147 = arith.constant 0 : index
    %c113 = arith.constant 113 : index
    %411 = vector.load %arg7[%c0_147, %c113] : memref<2x512xf32, #tpu.memory_space<vmem>>, vector<1x256xf32>
    %c1_148 = arith.constant 1 : index
    %c113_149 = arith.constant 113 : index
    %412 = vector.load %arg7[%c1_148, %c113_149] : memref<2x512xf32, #tpu.memory_space<vmem>>, vector<1x256xf32>
    %c18 = arith.constant 18 : index
    %413 = memref.load %arg5[%c18] : memref<98xf32, #tpu.memory_space<smem>>
    %c67 = arith.constant 67 : index
    %414 = memref.load %arg5[%c67] : memref<98xf32, #tpu.memory_space<smem>>
    %415 = vector.broadcast %413 : f32 to vector<1x256xf32>
    %416 = arith.mulf %411, %415 : vector<1x256xf32>
    %417 = arith.addf %400, %416 : vector<1x256xf32>
    %418 = vector.broadcast %414 : f32 to vector<1x256xf32>
    %419 = arith.mulf %412, %418 : vector<1x256xf32>
    %420 = arith.addf %417, %419 : vector<1x256xf32>
    %c0_150 = arith.constant 0 : index
    %c129 = arith.constant 129 : index
    %421 = vector.load %arg7[%c0_150, %c129] : memref<2x512xf32, #tpu.memory_space<vmem>>, vector<1x256xf32>
    %c1_151 = arith.constant 1 : index
    %c129_152 = arith.constant 129 : index
    %422 = vector.load %arg7[%c1_151, %c129_152] : memref<2x512xf32, #tpu.memory_space<vmem>>, vector<1x256xf32>
    %c25 = arith.constant 25 : index
    %423 = memref.load %arg5[%c25] : memref<98xf32, #tpu.memory_space<smem>>
    %c74 = arith.constant 74 : index
    %424 = memref.load %arg5[%c74] : memref<98xf32, #tpu.memory_space<smem>>
    %425 = vector.broadcast %423 : f32 to vector<1x256xf32>
    %426 = arith.mulf %421, %425 : vector<1x256xf32>
    %427 = arith.addf %410, %426 : vector<1x256xf32>
    %428 = vector.broadcast %424 : f32 to vector<1x256xf32>
    %429 = arith.mulf %422, %428 : vector<1x256xf32>
    %430 = arith.addf %427, %429 : vector<1x256xf32>
    %c0_153 = arith.constant 0 : index
    %c145 = arith.constant 145 : index
    %431 = vector.load %arg7[%c0_153, %c145] : memref<2x512xf32, #tpu.memory_space<vmem>>, vector<1x256xf32>
    %c1_154 = arith.constant 1 : index
    %c145_155 = arith.constant 145 : index
    %432 = vector.load %arg7[%c1_154, %c145_155] : memref<2x512xf32, #tpu.memory_space<vmem>>, vector<1x256xf32>
    %c32 = arith.constant 32 : index
    %433 = memref.load %arg5[%c32] : memref<98xf32, #tpu.memory_space<smem>>
    %c81_156 = arith.constant 81 : index
    %434 = memref.load %arg5[%c81_156] : memref<98xf32, #tpu.memory_space<smem>>
    %435 = vector.broadcast %433 : f32 to vector<1x256xf32>
    %436 = arith.mulf %431, %435 : vector<1x256xf32>
    %437 = arith.addf %420, %436 : vector<1x256xf32>
    %438 = vector.broadcast %434 : f32 to vector<1x256xf32>
    %439 = arith.mulf %432, %438 : vector<1x256xf32>
    %440 = arith.addf %437, %439 : vector<1x256xf32>
    %c0_157 = arith.constant 0 : index
    %c161 = arith.constant 161 : index
    %441 = vector.load %arg7[%c0_157, %c161] : memref<2x512xf32, #tpu.memory_space<vmem>>, vector<1x256xf32>
    %c1_158 = arith.constant 1 : index
    %c161_159 = arith.constant 161 : index
    %442 = vector.load %arg7[%c1_158, %c161_159] : memref<2x512xf32, #tpu.memory_space<vmem>>, vector<1x256xf32>
    %c39 = arith.constant 39 : index
    %443 = memref.load %arg5[%c39] : memref<98xf32, #tpu.memory_space<smem>>
    %c88 = arith.constant 88 : index
    %444 = memref.load %arg5[%c88] : memref<98xf32, #tpu.memory_space<smem>>
    %445 = vector.broadcast %443 : f32 to vector<1x256xf32>
    %446 = arith.mulf %441, %445 : vector<1x256xf32>
    %447 = arith.addf %430, %446 : vector<1x256xf32>
    %448 = vector.broadcast %444 : f32 to vector<1x256xf32>
    %449 = arith.mulf %442, %448 : vector<1x256xf32>
    %450 = arith.addf %447, %449 : vector<1x256xf32>
    %c0_160 = arith.constant 0 : index
    %c177 = arith.constant 177 : index
    %451 = vector.load %arg7[%c0_160, %c177] : memref<2x512xf32, #tpu.memory_space<vmem>>, vector<1x256xf32>
    %c1_161 = arith.constant 1 : index
    %c177_162 = arith.constant 177 : index
    %452 = vector.load %arg7[%c1_161, %c177_162] : memref<2x512xf32, #tpu.memory_space<vmem>>, vector<1x256xf32>
    %c46 = arith.constant 46 : index
    %453 = memref.load %arg5[%c46] : memref<98xf32, #tpu.memory_space<smem>>
    %c95_163 = arith.constant 95 : index
    %454 = memref.load %arg5[%c95_163] : memref<98xf32, #tpu.memory_space<smem>>
    %455 = vector.broadcast %453 : f32 to vector<1x256xf32>
    %456 = arith.mulf %451, %455 : vector<1x256xf32>
    %457 = arith.addf %440, %456 : vector<1x256xf32>
    %458 = vector.broadcast %454 : f32 to vector<1x256xf32>
    %459 = arith.mulf %452, %458 : vector<1x256xf32>
    %460 = arith.addf %457, %459 : vector<1x256xf32>
    %461 = arith.addf %460, %450 : vector<1x256xf32>
    %c1_i32 = arith.constant 1 : i32
    %462 = vector.broadcast %c1_i32 : i32 to vector<1x256xi32>
    %463 = arith.addi %63, %462 : vector<1x256xi32>
    %c0_i32_164 = arith.constant 0 : i32
    %464 = vector.broadcast %c0_i32_164 : i32 to vector<1x256xi32>
    %465 = arith.cmpi sge, %463, %464 : vector<1x256xi32>
    %c1_i32_165 = arith.constant 1 : i32
    %466 = vector.broadcast %c1_i32_165 : i32 to vector<1x256xi32>
    %467 = arith.addi %63, %466 : vector<1x256xi32>
    %c16_i32_166 = arith.constant 16 : i32
    %468 = vector.broadcast %c16_i32_166 : i32 to vector<1x256xi32>
    %469 = arith.cmpi slt, %467, %468 : vector<1x256xi32>
    %470 = arith.andi %465, %469 : vector<1x256xi1>
    %cst_167 = arith.constant 0.000000e+00 : f32
    %471 = vector.broadcast %cst_167 : f32 to vector<1x256xf32>
    %472 = arith.select %470, %461, %471 : vector<1x256xi1>, vector<1x256xf32>
    %cst_168 = arith.constant 0.000000e+00 : f32
    %473 = vector.broadcast %cst_168 : f32 to vector<1x256xf32>
    %cst_169 = arith.constant 0.000000e+00 : f32
    %474 = vector.broadcast %cst_169 : f32 to vector<1x256xf32>
    %c0_170 = arith.constant 0 : index
    %c82 = arith.constant 82 : index
    %475 = vector.load %arg7[%c0_170, %c82] : memref<2x512xf32, #tpu.memory_space<vmem>>, vector<1x256xf32>
    %c1_171 = arith.constant 1 : index
    %c82_172 = arith.constant 82 : index
    %476 = vector.load %arg7[%c1_171, %c82_172] : memref<2x512xf32, #tpu.memory_space<vmem>>, vector<1x256xf32>
    %c5 = arith.constant 5 : index
    %477 = memref.load %arg5[%c5] : memref<98xf32, #tpu.memory_space<smem>>
    %c54 = arith.constant 54 : index
    %478 = memref.load %arg5[%c54] : memref<98xf32, #tpu.memory_space<smem>>
    %479 = vector.broadcast %477 : f32 to vector<1x256xf32>
    %480 = arith.mulf %475, %479 : vector<1x256xf32>
    %481 = arith.addf %473, %480 : vector<1x256xf32>
    %482 = vector.broadcast %478 : f32 to vector<1x256xf32>
    %483 = arith.mulf %476, %482 : vector<1x256xf32>
    %484 = arith.addf %481, %483 : vector<1x256xf32>
    %c0_173 = arith.constant 0 : index
    %c98 = arith.constant 98 : index
    %485 = vector.load %arg7[%c0_173, %c98] : memref<2x512xf32, #tpu.memory_space<vmem>>, vector<1x256xf32>
    %c1_174 = arith.constant 1 : index
    %c98_175 = arith.constant 98 : index
    %486 = vector.load %arg7[%c1_174, %c98_175] : memref<2x512xf32, #tpu.memory_space<vmem>>, vector<1x256xf32>
    %c12 = arith.constant 12 : index
    %487 = memref.load %arg5[%c12] : memref<98xf32, #tpu.memory_space<smem>>
    %c61 = arith.constant 61 : index
    %488 = memref.load %arg5[%c61] : memref<98xf32, #tpu.memory_space<smem>>
    %489 = vector.broadcast %487 : f32 to vector<1x256xf32>
    %490 = arith.mulf %485, %489 : vector<1x256xf32>
    %491 = arith.addf %474, %490 : vector<1x256xf32>
    %492 = vector.broadcast %488 : f32 to vector<1x256xf32>
    %493 = arith.mulf %486, %492 : vector<1x256xf32>
    %494 = arith.addf %491, %493 : vector<1x256xf32>
    %c0_176 = arith.constant 0 : index
    %c114 = arith.constant 114 : index
    %495 = vector.load %arg7[%c0_176, %c114] : memref<2x512xf32, #tpu.memory_space<vmem>>, vector<1x256xf32>
    %c1_177 = arith.constant 1 : index
    %c114_178 = arith.constant 114 : index
    %496 = vector.load %arg7[%c1_177, %c114_178] : memref<2x512xf32, #tpu.memory_space<vmem>>, vector<1x256xf32>
    %c19 = arith.constant 19 : index
    %497 = memref.load %arg5[%c19] : memref<98xf32, #tpu.memory_space<smem>>
    %c68 = arith.constant 68 : index
    %498 = memref.load %arg5[%c68] : memref<98xf32, #tpu.memory_space<smem>>
    %499 = vector.broadcast %497 : f32 to vector<1x256xf32>
    %500 = arith.mulf %495, %499 : vector<1x256xf32>
    %501 = arith.addf %484, %500 : vector<1x256xf32>
    %502 = vector.broadcast %498 : f32 to vector<1x256xf32>
    %503 = arith.mulf %496, %502 : vector<1x256xf32>
    %504 = arith.addf %501, %503 : vector<1x256xf32>
    %c0_179 = arith.constant 0 : index
    %c130 = arith.constant 130 : index
    %505 = vector.load %arg7[%c0_179, %c130] : memref<2x512xf32, #tpu.memory_space<vmem>>, vector<1x256xf32>
    %c1_180 = arith.constant 1 : index
    %c130_181 = arith.constant 130 : index
    %506 = vector.load %arg7[%c1_180, %c130_181] : memref<2x512xf32, #tpu.memory_space<vmem>>, vector<1x256xf32>
    %c26 = arith.constant 26 : index
    %507 = memref.load %arg5[%c26] : memref<98xf32, #tpu.memory_space<smem>>
    %c75 = arith.constant 75 : index
    %508 = memref.load %arg5[%c75] : memref<98xf32, #tpu.memory_space<smem>>
    %509 = vector.broadcast %507 : f32 to vector<1x256xf32>
    %510 = arith.mulf %505, %509 : vector<1x256xf32>
    %511 = arith.addf %494, %510 : vector<1x256xf32>
    %512 = vector.broadcast %508 : f32 to vector<1x256xf32>
    %513 = arith.mulf %506, %512 : vector<1x256xf32>
    %514 = arith.addf %511, %513 : vector<1x256xf32>
    %c0_182 = arith.constant 0 : index
    %c146 = arith.constant 146 : index
    %515 = vector.load %arg7[%c0_182, %c146] : memref<2x512xf32, #tpu.memory_space<vmem>>, vector<1x256xf32>
    %c1_183 = arith.constant 1 : index
    %c146_184 = arith.constant 146 : index
    %516 = vector.load %arg7[%c1_183, %c146_184] : memref<2x512xf32, #tpu.memory_space<vmem>>, vector<1x256xf32>
    %c33 = arith.constant 33 : index
    %517 = memref.load %arg5[%c33] : memref<98xf32, #tpu.memory_space<smem>>
    %c82_185 = arith.constant 82 : index
    %518 = memref.load %arg5[%c82_185] : memref<98xf32, #tpu.memory_space<smem>>
    %519 = vector.broadcast %517 : f32 to vector<1x256xf32>
    %520 = arith.mulf %515, %519 : vector<1x256xf32>
    %521 = arith.addf %504, %520 : vector<1x256xf32>
    %522 = vector.broadcast %518 : f32 to vector<1x256xf32>
    %523 = arith.mulf %516, %522 : vector<1x256xf32>
    %524 = arith.addf %521, %523 : vector<1x256xf32>
    %c0_186 = arith.constant 0 : index
    %c162 = arith.constant 162 : index
    %525 = vector.load %arg7[%c0_186, %c162] : memref<2x512xf32, #tpu.memory_space<vmem>>, vector<1x256xf32>
    %c1_187 = arith.constant 1 : index
    %c162_188 = arith.constant 162 : index
    %526 = vector.load %arg7[%c1_187, %c162_188] : memref<2x512xf32, #tpu.memory_space<vmem>>, vector<1x256xf32>
    %c40 = arith.constant 40 : index
    %527 = memref.load %arg5[%c40] : memref<98xf32, #tpu.memory_space<smem>>
    %c89 = arith.constant 89 : index
    %528 = memref.load %arg5[%c89] : memref<98xf32, #tpu.memory_space<smem>>
    %529 = vector.broadcast %527 : f32 to vector<1x256xf32>
    %530 = arith.mulf %525, %529 : vector<1x256xf32>
    %531 = arith.addf %514, %530 : vector<1x256xf32>
    %532 = vector.broadcast %528 : f32 to vector<1x256xf32>
    %533 = arith.mulf %526, %532 : vector<1x256xf32>
    %534 = arith.addf %531, %533 : vector<1x256xf32>
    %c0_189 = arith.constant 0 : index
    %c178 = arith.constant 178 : index
    %535 = vector.load %arg7[%c0_189, %c178] : memref<2x512xf32, #tpu.memory_space<vmem>>, vector<1x256xf32>
    %c1_190 = arith.constant 1 : index
    %c178_191 = arith.constant 178 : index
    %536 = vector.load %arg7[%c1_190, %c178_191] : memref<2x512xf32, #tpu.memory_space<vmem>>, vector<1x256xf32>
    %c47 = arith.constant 47 : index
    %537 = memref.load %arg5[%c47] : memref<98xf32, #tpu.memory_space<smem>>
    %c96_192 = arith.constant 96 : index
    %538 = memref.load %arg5[%c96_192] : memref<98xf32, #tpu.memory_space<smem>>
    %539 = vector.broadcast %537 : f32 to vector<1x256xf32>
    %540 = arith.mulf %535, %539 : vector<1x256xf32>
    %541 = arith.addf %524, %540 : vector<1x256xf32>
    %542 = vector.broadcast %538 : f32 to vector<1x256xf32>
    %543 = arith.mulf %536, %542 : vector<1x256xf32>
    %544 = arith.addf %541, %543 : vector<1x256xf32>
    %545 = arith.addf %544, %534 : vector<1x256xf32>
    %c2_i32 = arith.constant 2 : i32
    %546 = vector.broadcast %c2_i32 : i32 to vector<1x256xi32>
    %547 = arith.addi %63, %546 : vector<1x256xi32>
    %c0_i32_193 = arith.constant 0 : i32
    %548 = vector.broadcast %c0_i32_193 : i32 to vector<1x256xi32>
    %549 = arith.cmpi sge, %547, %548 : vector<1x256xi32>
    %c2_i32_194 = arith.constant 2 : i32
    %550 = vector.broadcast %c2_i32_194 : i32 to vector<1x256xi32>
    %551 = arith.addi %63, %550 : vector<1x256xi32>
    %c16_i32_195 = arith.constant 16 : i32
    %552 = vector.broadcast %c16_i32_195 : i32 to vector<1x256xi32>
    %553 = arith.cmpi slt, %551, %552 : vector<1x256xi32>
    %554 = arith.andi %549, %553 : vector<1x256xi1>
    %cst_196 = arith.constant 0.000000e+00 : f32
    %555 = vector.broadcast %cst_196 : f32 to vector<1x256xf32>
    %556 = arith.select %554, %545, %555 : vector<1x256xi1>, vector<1x256xf32>
    %cst_197 = arith.constant 0.000000e+00 : f32
    %557 = vector.broadcast %cst_197 : f32 to vector<1x256xf32>
    %cst_198 = arith.constant 0.000000e+00 : f32
    %558 = vector.broadcast %cst_198 : f32 to vector<1x256xf32>
    %c0_199 = arith.constant 0 : index
    %c83 = arith.constant 83 : index
    %559 = vector.load %arg7[%c0_199, %c83] : memref<2x512xf32, #tpu.memory_space<vmem>>, vector<1x256xf32>
    %c1_200 = arith.constant 1 : index
    %c83_201 = arith.constant 83 : index
    %560 = vector.load %arg7[%c1_200, %c83_201] : memref<2x512xf32, #tpu.memory_space<vmem>>, vector<1x256xf32>
    %c6 = arith.constant 6 : index
    %561 = memref.load %arg5[%c6] : memref<98xf32, #tpu.memory_space<smem>>
    %c55 = arith.constant 55 : index
    %562 = memref.load %arg5[%c55] : memref<98xf32, #tpu.memory_space<smem>>
    %563 = vector.broadcast %561 : f32 to vector<1x256xf32>
    %564 = arith.mulf %559, %563 : vector<1x256xf32>
    %565 = arith.addf %557, %564 : vector<1x256xf32>
    %566 = vector.broadcast %562 : f32 to vector<1x256xf32>
    %567 = arith.mulf %560, %566 : vector<1x256xf32>
    %568 = arith.addf %565, %567 : vector<1x256xf32>
    %c0_202 = arith.constant 0 : index
    %c99 = arith.constant 99 : index
    %569 = vector.load %arg7[%c0_202, %c99] : memref<2x512xf32, #tpu.memory_space<vmem>>, vector<1x256xf32>
    %c1_203 = arith.constant 1 : index
    %c99_204 = arith.constant 99 : index
    %570 = vector.load %arg7[%c1_203, %c99_204] : memref<2x512xf32, #tpu.memory_space<vmem>>, vector<1x256xf32>
    %c13 = arith.constant 13 : index
    %571 = memref.load %arg5[%c13] : memref<98xf32, #tpu.memory_space<smem>>
    %c62 = arith.constant 62 : index
    %572 = memref.load %arg5[%c62] : memref<98xf32, #tpu.memory_space<smem>>
    %573 = vector.broadcast %571 : f32 to vector<1x256xf32>
    %574 = arith.mulf %569, %573 : vector<1x256xf32>
    %575 = arith.addf %558, %574 : vector<1x256xf32>
    %576 = vector.broadcast %572 : f32 to vector<1x256xf32>
    %577 = arith.mulf %570, %576 : vector<1x256xf32>
    %578 = arith.addf %575, %577 : vector<1x256xf32>
    %c0_205 = arith.constant 0 : index
    %c115 = arith.constant 115 : index
    %579 = vector.load %arg7[%c0_205, %c115] : memref<2x512xf32, #tpu.memory_space<vmem>>, vector<1x256xf32>
    %c1_206 = arith.constant 1 : index
    %c115_207 = arith.constant 115 : index
    %580 = vector.load %arg7[%c1_206, %c115_207] : memref<2x512xf32, #tpu.memory_space<vmem>>, vector<1x256xf32>
    %c20 = arith.constant 20 : index
    %581 = memref.load %arg5[%c20] : memref<98xf32, #tpu.memory_space<smem>>
    %c69 = arith.constant 69 : index
    %582 = memref.load %arg5[%c69] : memref<98xf32, #tpu.memory_space<smem>>
    %583 = vector.broadcast %581 : f32 to vector<1x256xf32>
    %584 = arith.mulf %579, %583 : vector<1x256xf32>
    %585 = arith.addf %568, %584 : vector<1x256xf32>
    %586 = vector.broadcast %582 : f32 to vector<1x256xf32>
    %587 = arith.mulf %580, %586 : vector<1x256xf32>
    %588 = arith.addf %585, %587 : vector<1x256xf32>
    %c0_208 = arith.constant 0 : index
    %c131 = arith.constant 131 : index
    %589 = vector.load %arg7[%c0_208, %c131] : memref<2x512xf32, #tpu.memory_space<vmem>>, vector<1x256xf32>
    %c1_209 = arith.constant 1 : index
    %c131_210 = arith.constant 131 : index
    %590 = vector.load %arg7[%c1_209, %c131_210] : memref<2x512xf32, #tpu.memory_space<vmem>>, vector<1x256xf32>
    %c27 = arith.constant 27 : index
    %591 = memref.load %arg5[%c27] : memref<98xf32, #tpu.memory_space<smem>>
    %c76 = arith.constant 76 : index
    %592 = memref.load %arg5[%c76] : memref<98xf32, #tpu.memory_space<smem>>
    %593 = vector.broadcast %591 : f32 to vector<1x256xf32>
    %594 = arith.mulf %589, %593 : vector<1x256xf32>
    %595 = arith.addf %578, %594 : vector<1x256xf32>
    %596 = vector.broadcast %592 : f32 to vector<1x256xf32>
    %597 = arith.mulf %590, %596 : vector<1x256xf32>
    %598 = arith.addf %595, %597 : vector<1x256xf32>
    %c0_211 = arith.constant 0 : index
    %c147 = arith.constant 147 : index
    %599 = vector.load %arg7[%c0_211, %c147] : memref<2x512xf32, #tpu.memory_space<vmem>>, vector<1x256xf32>
    %c1_212 = arith.constant 1 : index
    %c147_213 = arith.constant 147 : index
    %600 = vector.load %arg7[%c1_212, %c147_213] : memref<2x512xf32, #tpu.memory_space<vmem>>, vector<1x256xf32>
    %c34 = arith.constant 34 : index
    %601 = memref.load %arg5[%c34] : memref<98xf32, #tpu.memory_space<smem>>
    %c83_214 = arith.constant 83 : index
    %602 = memref.load %arg5[%c83_214] : memref<98xf32, #tpu.memory_space<smem>>
    %603 = vector.broadcast %601 : f32 to vector<1x256xf32>
    %604 = arith.mulf %599, %603 : vector<1x256xf32>
    %605 = arith.addf %588, %604 : vector<1x256xf32>
    %606 = vector.broadcast %602 : f32 to vector<1x256xf32>
    %607 = arith.mulf %600, %606 : vector<1x256xf32>
    %608 = arith.addf %605, %607 : vector<1x256xf32>
    %c0_215 = arith.constant 0 : index
    %c163 = arith.constant 163 : index
    %609 = vector.load %arg7[%c0_215, %c163] : memref<2x512xf32, #tpu.memory_space<vmem>>, vector<1x256xf32>
    %c1_216 = arith.constant 1 : index
    %c163_217 = arith.constant 163 : index
    %610 = vector.load %arg7[%c1_216, %c163_217] : memref<2x512xf32, #tpu.memory_space<vmem>>, vector<1x256xf32>
    %c41 = arith.constant 41 : index
    %611 = memref.load %arg5[%c41] : memref<98xf32, #tpu.memory_space<smem>>
    %c90 = arith.constant 90 : index
    %612 = memref.load %arg5[%c90] : memref<98xf32, #tpu.memory_space<smem>>
    %613 = vector.broadcast %611 : f32 to vector<1x256xf32>
    %614 = arith.mulf %609, %613 : vector<1x256xf32>
    %615 = arith.addf %598, %614 : vector<1x256xf32>
    %616 = vector.broadcast %612 : f32 to vector<1x256xf32>
    %617 = arith.mulf %610, %616 : vector<1x256xf32>
    %618 = arith.addf %615, %617 : vector<1x256xf32>
    %c0_218 = arith.constant 0 : index
    %c179 = arith.constant 179 : index
    %619 = vector.load %arg7[%c0_218, %c179] : memref<2x512xf32, #tpu.memory_space<vmem>>, vector<1x256xf32>
    %c1_219 = arith.constant 1 : index
    %c179_220 = arith.constant 179 : index
    %620 = vector.load %arg7[%c1_219, %c179_220] : memref<2x512xf32, #tpu.memory_space<vmem>>, vector<1x256xf32>
    %c48 = arith.constant 48 : index
    %621 = memref.load %arg5[%c48] : memref<98xf32, #tpu.memory_space<smem>>
    %c97_221 = arith.constant 97 : index
    %622 = memref.load %arg5[%c97_221] : memref<98xf32, #tpu.memory_space<smem>>
    %623 = vector.broadcast %621 : f32 to vector<1x256xf32>
    %624 = arith.mulf %619, %623 : vector<1x256xf32>
    %625 = arith.addf %608, %624 : vector<1x256xf32>
    %626 = vector.broadcast %622 : f32 to vector<1x256xf32>
    %627 = arith.mulf %620, %626 : vector<1x256xf32>
    %628 = arith.addf %625, %627 : vector<1x256xf32>
    %629 = arith.addf %628, %618 : vector<1x256xf32>
    %c3_i32 = arith.constant 3 : i32
    %630 = vector.broadcast %c3_i32 : i32 to vector<1x256xi32>
    %631 = arith.addi %63, %630 : vector<1x256xi32>
    %c0_i32_222 = arith.constant 0 : i32
    %632 = vector.broadcast %c0_i32_222 : i32 to vector<1x256xi32>
    %633 = arith.cmpi sge, %631, %632 : vector<1x256xi32>
    %c3_i32_223 = arith.constant 3 : i32
    %634 = vector.broadcast %c3_i32_223 : i32 to vector<1x256xi32>
    %635 = arith.addi %63, %634 : vector<1x256xi32>
    %c16_i32_224 = arith.constant 16 : i32
    %636 = vector.broadcast %c16_i32_224 : i32 to vector<1x256xi32>
    %637 = arith.cmpi slt, %635, %636 : vector<1x256xi32>
    %638 = arith.andi %633, %637 : vector<1x256xi1>
    %cst_225 = arith.constant 0.000000e+00 : f32
    %639 = vector.broadcast %cst_225 : f32 to vector<1x256xf32>
    %640 = arith.select %638, %629, %639 : vector<1x256xi1>, vector<1x256xf32>
    %641 = arith.addf %147, %231 : vector<1x256xf32>
    %642 = arith.addf %315, %388 : vector<1x256xf32>
    %643 = arith.addf %472, %556 : vector<1x256xf32>
    %644 = arith.addf %641, %642 : vector<1x256xf32>
    %645 = arith.addf %643, %640 : vector<1x256xf32>
    %646 = arith.addf %644, %645 : vector<1x256xf32>
    %cst_226 = arith.constant 5.000000e-01 : f32
    %647 = vector.broadcast %cst_226 : f32 to vector<1x256xf32>
    %648 = arith.mulf %647, %646 : vector<1x256xf32>
    %649 = math.tanh %648 : vector<1x256xf32>
    %cst_227 = arith.constant 1.000000e+00 : f32
    %650 = vector.broadcast %cst_227 : f32 to vector<1x256xf32>
    %651 = arith.addf %649, %650 : vector<1x256xf32>
    %cst_228 = arith.constant 5.000000e-01 : f32
    %652 = vector.broadcast %cst_228 : f32 to vector<1x256xf32>
    %653 = arith.mulf %652, %651 : vector<1x256xf32>
    %654 = vector.broadcast %653 : vector<1x256xf32> to vector<32x256xf32>
    %655 = arith.mulf %51, %654 : vector<32x256xf32>
    %c0_229 = arith.constant 0 : index
    %c0_230 = arith.constant 0 : index
    %c0_231 = arith.constant 0 : index
    %656 = vector.load %arg6[%c0_229, %c0_230, %c0_231] : memref<1x32x256xf32, #tpu.memory_space<vmem>>, vector<1x32x256xf32>
    %657 = vector.shape_cast %656 : vector<1x32x256xf32> to vector<32x256xf32>
    %658 = vector.shape_cast %655 : vector<32x256xf32> to vector<1x32x256xf32>
    tpu.vector_store %arg6[%c0_229, %c0_230, %c0_231], %658 {strides = array<i32>} : memref<1x32x256xf32, #tpu.memory_space<vmem>>, vector<1x32x256xf32>,
    return
  }
  func.func @transform_0(%arg0: i32) -> (i32, i32, i32) {
    %c0_i32 = arith.constant 0 : i32
    %c0_i32_0 = arith.constant 0 : i32
    %c0_i32_1 = arith.constant 0 : i32
    return %arg0, %c0_i32, %c0_i32_0 : i32, i32, i32
  }
  func.func @transform_1(%arg0: i32) -> (i32, i32) {
    %c0_i32 = arith.constant 0 : i32
    %c0_i32_0 = arith.constant 0 : i32
    %c0_i32_1 = arith.constant 0 : i32
    return %c0_i32, %c0_i32_0 : i32, i32
  }
  func.func @transform_2(%arg0: i32) -> (i32, i32) {
    %c0_i32 = arith.constant 0 : i32
    %c0_i32_0 = arith.constant 0 : i32
    %c0_i32_1 = arith.constant 0 : i32
    return %c0_i32, %c0_i32_0 : i32, i32
  }
  func.func @transform_3(%arg0: i32) -> (i32, i32) {
    %c0_i32 = arith.constant 0 : i32
    %c0_i32_0 = arith.constant 0 : i32
    %c0_i32_1 = arith.constant 0 : i32
    return %c0_i32, %c0_i32_0 : i32, i32
  }
  func.func @transform_4(%arg0: i32) -> i32 {
    %c0_i32 = arith.constant 0 : i32
    %c0_i32_0 = arith.constant 0 : i32
    return %c0_i32 : i32
  }
  func.func @transform_5(%arg0: i32) -> (i32, i32, i32) {
    %c0_i32 = arith.constant 0 : i32
    %c0_i32_0 = arith.constant 0 : i32
    %c0_i32_1 = arith.constant 0 : i32
    return %arg0, %c0_i32, %c0_i32_0 : i32, i32, i32
  }
}

</mosaic_0001>

<bundles_post_ra>
// kernel: tpu_custom_call.1
= control target key start
LH: loop header
LB: loop body
LE: loop exit
PB: predicated region body
PF: predicated region fallthrough
CT: control target
= control target key end

     0   :  { %s2965_s0 = inlined_call_operand.hbm [shape: f32[2,32,256], index: 0, kind: input, shape index: {}]   ;;  %s2966_s1 = inlined_call_operand.vmem [shape: f32[32,2], index: 1, kind: input, shape index: {}]   ;;  %s2967_s2 = inlined_call_operand.vmem [shape: f32[32,2], index: 2, kind: input, shape index: {}]   ;;  %s2968_s3 = inlined_call_operand.vmem [shape: s32[1,256], index: 3, kind: input, shape index: {}]   ;;  %s2969_s4 = inlined_call_operand.vmem [shape: f32[98], index: 4, kind: input, shape index: {}]   ;;  %s2970_s5 = inlined_call_operand.hbm [shape: f32[2,32,256], index: 5, kind: output, shape index: {}]  }
   0x1   :  { %2995 = sst [smem:[#allocation29_spill]] %s2965_s0 }
   0x2   :  { %2996 = sst [smem:[#allocation30_spill]] %s2966_s1 }
   0x3   :  { %2997 = sst [smem:[#allocation31_spill]] %s2967_s2 }
   0x4   :  { %2998 = sst [smem:[#allocation32_spill]] %s2968_s3 }
   0x5   :  { %2999 = sst [smem:[#allocation33_spill]] %s2969_s4 }
   0x6   :  { %3000 = sst [smem:[#allocation34_spill]] %s2970_s5 }
   0x7   :  { %10 = vsyncpa [#allocation4], 0 }
   0x8   :  { %12 = vsyncpa [#allocation4 + $0x1], 0 }
   0x9   :  { %13 = vsyncpa [#allocation6], 0 }
   0xa   :  { %14 = vsyncpa [#allocation5], 0 }
   0xb   :  { %16 = vsyncpa [#allocation5 + $0x1], 0  ;;  %s2025_s18 = smov 0   ;;  %s2027_s19 = smov 0  }
   0xc   :  { %s2029_s20 = smov 0   ;;  %s2031_s21 = smov 0  }
   0xd LB: > { %3001 = sst [smem:[#allocation12_spill]] %s1959_s18  ;;  %s2046_s22 = sadd.s32 4294967295, %s1971_s21   ;;  %s1971_s21 = sphi %s2031_s21, %s3066_s21   ;;  %s1967_s20 = sphi %s2029_s20, %s3069_s20   ;;  %s1963_s19 = sphi %s2027_s19, %s3068_s19   ;;  %s1959_s18 = sphi %s2025_s18, %s3067_s18  }
   0xe   : > { %3002 = sst [smem:[#allocation13_spill]] %s1963_s19  ;;  %s1641_s23 = sadd.s32 4294967294, %s1971_s21  }
   0xf   : > { %3003 = sst [smem:[#allocation14_spill]] %s1967_s20  ;;  %s2050_s24 = sadd.s32 1, %s1971_s21  }
  0x10   : > { %3004 = sst [smem:[#allocation15_spill]] %s1971_s21  ;;  %s29_s25 = sadd.s32 1, %s1967_s20 }
  0x11   : > { %3005 = sst [smem:[#allocation16_spill]] %s2046_s22  ;;  %s26_s26 = ssub.s32 %s1971_s21, %s2050_s24 }
  0x12   : > { %3006 = sst [smem:[#allocation17_spill]] %s2050_s24  ;;  %p36_p0 = scmp.ne.s32.totalorder %s1967_s20, %s1963_s19 }
  0x13   : > { %p27_p1 = scmp.eq.s32.totalorder %s26_s26, 0  ;;  %p37_p2 = scmp.eq.s32.totalorder %s1971_s21, 0 }
  0x14   : > { %p42_p3 = scmp.ne.s32.totalorder %s1963_s19, %s1959_s18  ;;  %p2972_p4 = scmp.eq.s32.totalorder %s2046_s22, 0 }
  0x15   : > { %s2062_s27 = scalar_select %p27_p1, %s1967_s20, %s29_s25  }
  0x16   : > { %p2064_p5 = por %p37_p2, %p36_p0  ;;  %p2070_p6 = por %p2972_p4, %p42_p3 }
  0x17   : > { %3007 = sst [smem:[#allocation18_spill]] %s2062_s27  ;;  %p150_p7 = scmp.eq.s32.totalorder %s2046_s22, 1 }
  0x18   : > { %s3009_s29 = scalar_select %p2070_p6, 1, 0 }
  0x19   : > { %p156_p8 = scmp.eq.s32.totalorder %s1641_s23, 1  ;;  %p1642_p9 = scmp.ge.s32.totalorder %s1971_s21, 1 }
  0x1a   : > { %p163_p10 = scmp.lt.s32.totalorder %s1971_s21, 3  ;;  %p2077_p11 = por %p150_p7, %p36_p0 }
  0x1b   : > { %p2081_p12 = por %p156_p8, %p42_p3  ;;  %s3015_s4 = sld [smem:[#allocation33_spill]] }
  0x1c   : > { %s3010_s30 = scalar_select %p2077_p11, 1, 0 }
  0x1d   : > { %s3012_s6 = scalar_select %p2081_p12, 1, 0 }
  0x1e   : > { %3011 = sst [smem:[#allocation19_spill]] %s3010_s30  ;;  %p2085_p13 = pnand %p1642_p9, %p163_p10 }
  0x1f   : > { %3013 = sst [smem:[#allocation20_spill]] %s3012_s6  ;;  %p1777_p2 = scmp.lt.s32.totalorder %s1971_s21, 2 }
  0x20   : > { %p1764_p1 = pneg %p2085_p13  ;;  %s196_s12 = sand.u32 1, %s1967_s20  }
  0x21   : > { %s185_s10 = sshll.u32 %s3015_s4, 4  ;;  %p2105_p3 = pnand %p1777_p2, %p2064_p5  ;;  %s186_s10 = int_to_ptr.vmem [resolvable:$true] %s185_s10 }
  0x22   : > { %p2098_p7 = pnand %p1764_p1, %p2972_p4  ;;  %s1645_s14 = sshll.u32 %s196_s12, 6 }
  0x23   : > { %s1856_s15 = scalar_lea.vmem %s186_s10, 16  ;;  %p1864_p12 = scmp.lt.s32.totalorder %s186_s10, %s186_s10 }
  0x24   : > { %p1857_p8 = scmp.ne.s32.totalorder %s186_s10, %s1856_s15  ;;  %p1858_p9 = pneg %p2098_p7 }
  0x25   : > { %p1865_p11 = scmp.lt.s32.totalorder %s1856_s15, %s1856_s15 }
  0x26   : > { %p1859_p10 = pnand %p1858_p9, %p1857_p8 }
  0x27   : > { %p1866_p1 = por %p1865_p11, %p1864_p12 }
  0x28   : > { %p1860_p0 = pneg %p1859_p10 }
  0x2a   : > { %p1867_p4 = pnand %p1866_p1, %p1860_p0 }
  0x2c   : > { %1870 = shalt.err (!%p1867_p4)
}
  0x2d   : > { %s1973_s16 = smov [#allocation7]   ;;  %s1754_s17 = sshll.u32 %s1971_s21, 10 }
  0x2e   : > { %1767 = dma.vmem_to_smem (!%p2098_p7), %s186_s10, 16, %s1973_s16, [#allocation6]  }
  0x2f   : > { %s200_s23 = scalar_lea.vmem [#allocation3], %s1645_s14  ;;  %s3018_s0 = sld [smem:[#allocation29_spill]] }
  0x30   : > { %s207_s25 = sshll.u32 %s200_s23, 4  ;;  %s2121_s9 = scalar_lea.sflag [#allocation4], %s196_s12  ;;  %s2119_s25 = int_to_ptr.vmem [resolvable:$true] %s207_s25 }
  0x31   : > { %p1873_p5 = pneg %p2105_p3 }
  0x35   : > { %s2117_s8 = scalar_lea.hbm %s3018_s0, %s1754_s17  ;;  %s1876_s15 = scalar_lea.hbm %s3018_s0, 2048 }
  0x36   : > { %s1871_s11 = scalar_lea.hbm %s2117_s8, 1024  ;;  %p1877_p0 = scmp.lt.u32.totalorder %s2117_s8, %s3018_s0 }
  0x37   : > { %p1872_p4 = scmp.ne.s32.totalorder %s2117_s8, %s1871_s11  ;;  %p1878_p2 = scmp.lt.u32.totalorder %s1876_s15, %s1871_s11 }
  0x38   : > { %p1880_p8 = scmp.lt.u32.totalorder %s1871_s11, %s2117_s8 }
  0x39   : > { %p1874_p11 = pnand %p1873_p5, %p1872_p4  ;;  %p1879_p7 = por %p1878_p2, %p1877_p0 }
  0x3b   : > { %p1875_p12 = pneg %p1874_p11  ;;  %p1881_p9 = por %p1880_p8, %p1879_p7 }
  0x3d   : > { %p1882_p10 = pnand %p1881_p9, %p1875_p12 }
  0x3f   : > { %1885 = shalt.err (!%p1882_p10)
}
  0x40   : > { %s1886_s12 = scalar_lea.vmem %s2119_s25, 1024  ;;  %s1974_s23 = smov [#allocation3]  }
  0x41   : > { %p1887_p1 = scmp.ne.s32.totalorder %s2119_s25, %s1886_s12  ;;  %s1891_s26 = sshll.u32 %s1974_s23, 4  ;;  %s1892_s26 = int_to_ptr.vmem [resolvable:$false] %s1891_s26 }
  0x42   : > { %s1893_s28 = scalar_lea.vmem %s1892_s26, 2048  ;;  %p1894_p6 = scmp.lt.s32.totalorder %s2119_s25, %s1892_s26 }
  0x43   : > { %p1889_p4 = pnand %p1887_p1, %p1873_p5  ;;  %p1895_p0 = scmp.lt.s32.totalorder %s1893_s28, %s1886_s12 }
  0x45   : > { %p1890_p11 = pneg %p1889_p4  ;;  %p1896_p2 = por %p1895_p0, %p1894_p6 }
  0x47   : > { %p1897_p7 = pnand %p1896_p2, %p1890_p11 }
  0x49   : > { %1900 = shalt.err (!%p1897_p7)
}
  0x4a   : > { %s1975_s11 = smov 256   ;;  %s1976_s10 = smov 16  }
  0x4b   : > { %1771 = dma.hbm_to_vmem [thread:$0]  (!%p2105_p3), %s2117_s8, 1024, %s2119_s25, %s2121_s9, %s1975_s11, %s1975_s11, %s1976_s10  }
  0x4c   : > { %219 = sbr.rel (%p2085_p13) target bundleno = 997 (0x3e5), region = 40 }
  0x53   : > { %s2152_s14 = sand.u32 1, %s1963_s19   ;;  %p3020_p6 = scmp.ne.s32.totalorder %s3009_s29, 0 }
  0x54   : > { %3019 = sst [smem:[#allocation21_spill]] %s2152_s14  ;;  %s2974_s15 = sshll.u32 %s2152_s14, 6 }
  0x55   : > { %s222_s16 = scalar_lea.sflag [#allocation4], %s2152_s14  ;;  %s225_s17 = scalar_lea.vmem [#allocation3], %s2974_s15 }
  0x56   : > { %1946 = dma.done.wait (%p3020_p6), %s222_s16, 1024  }
  0x57   : > { %1948 = vsyncadd (%p3020_p6), %s222_s16, 4294966272  ;;  %p3021_p3 = scmp.eq.s32.totalorder %s2046_s22, 0 }
  0x59   : > { %1950 = dma.done.wait (%p3021_p3), [#allocation6], 16   ;;  %p3022_p13 = pmov %p3021_p3 }
  0x5b   : > { %1952 = vsyncadd (%p3022_p13), [#allocation6], 4294967280 }
  0x5c   : > { %234 = sfence }
  0x5d   : > { %v2166_v0 = vld [vmem:[%s225_s17 + $0x20] sm:$0xff]  ;;  %v2168_v1 = vld [vmem:[%s225_s17 + $0x28] sm:$0xff]  ;;  %v2176_v5 = vld [vmem:[%s225_s17 + $0x10] sm:$0xff]  ;;  %v1977_v7 = vmov 0   ;;  %s3023_s1 = sld [smem:[#allocation30_spill]]  ;;  %v1978_v19 = vmov 1   ;;  %v294_v34 = vlaneseq }
  0x5e   : > { %v2170_v2 = vld [vmem:[%s225_s17] sm:$0xff]  ;;  %v271_v3 = vadd.f32 %v2168_v1, %v2166_v0  ;;  %v2174_v4 = vld [vmem:[%s225_s17 + $0x8] sm:$0xff]  ;;  %v2178_v6 = vld [vmem:[%s225_s17 + $0x18] sm:$0xff]  ;;  %1833 = vset.pattern.permute.xlu1 %v1977_v7  ;;  %1832 = vset.pattern.permute.xlu0 %v1977_v7  ;;  %v288_v16 = vmax.f32 %v2166_v0, %v2168_v1  ;;  %s3024_s2 = sld [smem:[#allocation31_spill]]  ;;  %vm333_vm1 = vcmask 15360   ;;  %s2283_s13 = sld [smem:[#allocation7 + $0x47]] }
  0x5f   : > { %v265_v8 = vadd.f32 %v2174_v4, %v2170_v2  ;;  %v282_v9 = vmax.f32 %v2170_v2, %v2174_v4  ;;  %v268_v10 = vadd.f32 %v2178_v6, %v2176_v5  ;;  %v2186_v11 = vld [vmem:[%s225_s17 + $0x30] sm:$0xff]  ;;  %v2188_v12 = vld [vmem:[%s225_s17 + $0x38] sm:$0xff]  ;;  %v285_v14 = vmax.f32 %v2176_v5, %v2178_v6  ;;  %s2285_s25 = sld [smem:[#allocation7 + $0x46]]  ;;  %s2287_s8 = sld [smem:[#allocation7 + $0x4a]] }
  0x60   : > { %272 = vadd.xlane.f32.xlu1 %v271_v3  ;;  %v274_v13 = vadd.f32 %v2188_v12, %v2186_v11  ;;  %v291_v15 = vmax.f32 %v2186_v11, %v2188_v12  ;;  %v295_v36 = vand.u32 127, %v294_v34  ;;  %s2289_s9 = sld [smem:[#allocation7 + $0x48]]  ;;  %vm527_vm2 = vcmp.lt.s32.totalorder %v294_v34, 256  ;;  %s2292_s12 = sld [smem:[#allocation7 + $0x55]] }
  0x61   : > { %266 = vadd.xlane.f32.xlu0 %v265_v8  ;;  %s2294_s23 = sld [smem:[#allocation7 + $0x4b]]  ;;  %s2296_s26 = sld [smem:[#allocation7 + $0x58]]  ;;  %vm579_vm3 = vcmask 785408   ;;  %vm624_vm4 = vcmask 523264   ;;  %vm665_vm5 = vcmask 261120   ;;  %vm682_vm6 = vcmask 916480  }
  0x62   : > { %vm296_vm0 = vcmp.eq.s32.totalorder %v295_v36, 0  ;;  %s2298_s28 = sld [smem:[#allocation7 + $0x49]]  ;;  %s2300_s11 = sld [smem:[#allocation7 + $0x5a]]  ;;  %vm829_vm11 = vcmask 408576  }
  0x63   : > { %v302_v17 = vld [vmem:[%s3023_s1 + $0x8] sm:$0xff]  ;;  %v301_v18 = vld [vmem:[%s3023_s1] sm:$0xff]  ;;  %v303_v21 = vld [vmem:[%s3023_s1 + $0x10] sm:$0xff]  ;;  %s2302_s10 = sld [smem:[#allocation7 + $0x4c]]  ;;  %s2304_s16 = sld [smem:[#allocation7 + $0x40]] }
  0x64   : > { %283 = vmax.xlane.f32.xlu1 %v282_v9  ;;  %v306_v20 = vld [vmem:[%s3024_s2 + $0x8] sm:$0xff]  ;;  %v308_v22 = vld [vmem:[%s3024_s2 + $0x18] sm:$0xff]  ;;  %v305_v24 = vld [vmem:[%s3024_s2] sm:$0xff]  ;;  %s2306_s17 = sld [smem:[#allocation7 + $0x54]]  ;;  %s2308_s29 = sld [smem:[#allocation7 + $0x43]] }
  0x65   : > { %269 = vadd.xlane.f32.xlu0 %v268_v10  ;;  %v304_v23 = vld [vmem:[%s3023_s1 + $0x18] sm:$0xff]  ;;  %v307_v25 = vld [vmem:[%s3024_s2 + $0x10] sm:$0xff]  ;;  %s2310_s7 = sld [smem:[#allocation7 + $0x56]]  ;;  %s2314_s0 = sld [smem:[#allocation7 + $0x59]] }
  0x66   : > { %s2312_s15 = sld [smem:[#allocation7 + $0x4e]]  ;;  %s2316_s1 = sld [smem:[#allocation7 + $0x7]] }
  0x67   : > { %s2318_s2 = sld [smem:[#allocation7 + $0x38]]  ;;  %s2320_s4 = sld [smem:[#allocation7 + $0xb]] }
  0x68   : > { %275 = vadd.xlane.f32.xlu1 %v274_v13  ;;  %s2322_s27 = sld [smem:[#allocation7 + $0x3c]]  ;;  %s2326_s20 = sld [smem:[#allocation7 + $0xa]] }
  0x69   : > { %286 = vmax.xlane.f32.xlu0 %v285_v14  ;;  %s2328_s19 = sld [smem:[#allocation7 + $0x3b]]  ;;  %s2330_s24 = sld [smem:[#allocation7 + $0xd]] }
  0x6a   : > { %s2332_s21 = sld [smem:[#allocation7 + $0x3e]]  ;;  %s2336_s6 = sld [smem:[#allocation7 + $0x8]] }
  0x6b   : > { %s2340_s18 = sld [smem:[#allocation7 + $0x39]]  ;;  %s2988_s30 = smov 96  }
  0x6c   : > { %292 = vmax.xlane.f32.xlu1 %v291_v15  ;;  %s2352_s5 = sld [smem:[#allocation7 + $0xc]]  ;;  %s2354_s14 = sld [smem:[#allocation7 + $0x3d]] }
  0x6d   : > { %289 = vmax.xlane.f32.xlu0 %v288_v16  ;;  %s2356_s22 = sld [smem:[#allocation7 + $0x1]]  ;;  %s2372_s3 = sld [smem:[#allocation7 + $0x3]] }
  0x73   : > { %3030 = sst [smem:[#allocation27_spill]] %s2356_s22  ;;  %s3032_s22 = smov 96  }
  0x7d   : > { %316 = vperm.xlu1 %1833, %v302_v17  }
  0x81   : > { %1834 = vset.pattern.permute.xlu1 %v1978_v19 }
  0x82   : > { %373 = vperm.xlu1 %1834, %v301_v18  }
  0x83   : > { %311 = vperm.xlu0 %1832, %v301_v18  }
  0x86   : > { %377 = vperm.xlu1 %1834, %v302_v17  }
  0x87   : > { %1841 = vset.pattern.permute.xlu0 %v1978_v19 }
  0x88   : > { %411 = vperm.xlu0 %1841, %v306_v20  }
  0x8a   : > { %1835 = vset.pattern.permute.xlu1 %v1977_v7 }
  0x8b   : > { %321 = vperm.xlu1 %1835, %v303_v21  }
  0x8c   : > { %1842 = vset.pattern.permute.xlu0 %v1977_v7 }
  0x8d   : > { %355 = vperm.xlu0 %1842, %v306_v20  }
  0x8f   : > { %1836 = vset.pattern.permute.xlu1 %v1978_v19 }
  0x90   : > { %381 = vperm.xlu1 %1836, %v303_v21  }
  0x91   : > { %365 = vperm.xlu0 %1842, %v308_v22  }
  0x94   : > { %1837 = vset.pattern.permute.xlu1 %v1977_v7 }
  0x95   : > { %326 = vperm.xlu1 %1837, %v304_v23   ;;  %1845 = vset.pattern.permute.xlu0 %v1978_v19 }
  0x99   : > { %1838 = vset.pattern.permute.xlu1 %v1978_v19 }
  0x9a   : > { %385 = vperm.xlu1 %1838, %v304_v23  }
  0x9e   : > { %1839 = vset.pattern.permute.xlu1 %v1977_v7 }
  0x9f   : > { %350 = vperm.xlu1 %1839, %v305_v24  }
  0xa3   : > { %1840 = vset.pattern.permute.xlu1 %v1978_v19 }
  0xa4   : > { %407 = vperm.xlu1 %1840, %v305_v24  }
  0xa8   : > { %1843 = vset.pattern.permute.xlu1 %v1977_v7 }
  0xa9   : > { %360 = vperm.xlu1 %1843, %v307_v25  }
  0xad   : > { %1844 = vset.pattern.permute.xlu1 %v1978_v19 }
  0xae   : > { %415 = vperm.xlu1 %1844, %v307_v25  }
  0xb2   : > { %419 = vperm.xlu1 %1844, %v308_v22  }
  0xed   : > { %v273_v26 = vpop.xlane.xlu1 %272 }
  0xee   : > { %v267_v28 = vpop.xlane.xlu0 %266  ;;  %v280_v43 = vmul.f32 0.00390625, %v273_v26 }
  0xef   : > { %v278_v39 = vmul.f32 0.00390625, %v267_v28 }
  0xf1   : > { %v284_v27 = vpop.xlane.xlu1 %283 }
  0xf2   : > { %v270_v31 = vpop.xlane.xlu0 %269  ;;  %v297_v45 = vsel %vm296_vm0, %v278_v39, %v284_v27 }
  0xf3   : > { %v279_v40 = vmul.f32 0.00390625, %v270_v31 }
  0xf5   : > { %v276_v29 = vpop.xlane.xlu1 %275 }
  0xf6   : > { %v287_v33 = vpop.xlane.xlu0 %286  ;;  %v281_v52 = vmul.f32 0.00390625, %v276_v29 }
  0xf7   : > { %v298_v44 = vsel %vm296_vm0, %v279_v40, %v287_v33 }
  0xf9   : > { %v293_v30 = vpop.xlane.xlu1 %292 }
  0xfa   : > { %v290_v38 = vpop.xlane.xlu0 %289  ;;  %v300_v56 = vsel %vm296_vm0, %v281_v52, %v293_v30 }
  0xfb   : > { %v299_v47 = vsel %vm296_vm0, %v280_v43, %v290_v38 }
  0xfd   : > { %v317_v32 = vpop.permute.xlu1 %316 }
  0xfe   : > { %v330_v48 = vmul.f32 %v317_v32, %v298_v44 }
 0x100   : > { %v335_v54 = vsel %vm333_vm1, %v330_v48, 0.0 }
 0x101   : > { %v374_v35 = vpop.permute.xlu1 %373 }
 0x102   : > { %v312_v41 = vpop.permute.xlu0 %311  ;;  %v388_v57 = vmul.f32 %v374_v35, %v297_v45 }
 0x103   : > { %v329_v46 = vmul.f32 %v312_v41, %v297_v45 }
 0x104   : > { %v392_v7 = vsel %vm333_vm1, %v388_v57, 0.0  ;;  %v1979_v57 = vmov 0.0  }
 0x105   : > { %v378_v37 = vpop.permute.xlu1 %377  ;;  %v334_v51 = vsel %vm333_vm1, %v329_v46, 0.0  ;;  %505 = vst [vmem:[#allocation2] sm:$0x3] %v1979_v57  ;;  %506 = vst [vmem:[#allocation2 + $0x6] sm:$0x3] %v1979_v57 }
 0x106   : > { %v389_v53 = vmul.f32 %v378_v37, %v298_v44  ;;  %v336_v58 = vadd.f32 %v335_v54, %v334_v51 }
 0x107   : > { %v412_v27 = vpop.permute.xlu0 %411 }
 0x108   : > { %v393_v62 = vsel %vm333_vm1, %v389_v53, 0.0 }
 0x109   : > { %v394_v10 = vadd.f32 %v393_v62, %v392_v7 }
 0x10a   : > { %v322_v42 = vpop.permute.xlu1 %321 }
 0x10b   : > { %v331_v49 = vmul.f32 %v322_v42, %v299_v47 }
 0x10c   : > { %v356_v36 = vpop.permute.xlu0 %355 }
 0x10d   : > { %v337_v55 = vsel %vm333_vm1, %v331_v49, 0.0 }
 0x10e   : > { %v338_v63 = vadd.f32 %v337_v55, %v336_v58 }
 0x10f   : > { %v382_v50 = vpop.permute.xlu1 %381 }
 0x110   : > { %v390_v59 = vmul.f32 %v382_v50, %v299_v47  ;;  %v366_v44 = vpop.permute.xlu0 %365 }
 0x112   : > { %v395_v8 = vsel %vm333_vm1, %v390_v59, 0.0 }
 0x113   : > { %v396_v16 = vadd.f32 %v395_v8, %v394_v10 }
 0x114   : > { %v327_v60 = vpop.permute.xlu1 %326 }
 0x115   : > { %v332_v61 = vmul.f32 %v327_v60, %v300_v56 }
 0x117   : > { %v339_v3 = vsel %vm333_vm1, %v332_v61, 0.0 }
 0x118   : > { %v340_v9 = vadd.f32 %v339_v3, %v338_v63 }
 0x119   : > { %v386_v13 = vpop.permute.xlu1 %385 }
 0x11a   : > { %v341_v14 = vrot.slane %v340_v9, 4  ;;  %v391_v15 = vmul.f32 %v386_v13, %v300_v56 }
 0x11c   : > { %v342_v17 = vadd.f32 %v341_v14, %v340_v9  ;;  %v397_v18 = vsel %vm333_vm1, %v391_v15, 0.0 }
 0x11d   : > { %v398_v19 = vadd.f32 %v397_v18, %v396_v16 }
 0x11e   : > { %v343_v20 = vrot.slane %v342_v17, 2  ;;  %v351_v21 = vpop.permute.xlu1 %350 }
 0x11f   : > { %v399_v22 = vrot.slane %v398_v19, 4 }
 0x120   : > { %v344_v23 = vadd.f32 %v343_v20, %v342_v17 }
 0x121   : > { %v400_v24 = vadd.f32 %v399_v22, %v398_v19 }
 0x122   : > { %v345_v25 = vrot.slane %v344_v23, 1 }
 0x123   : > { %v401_v26 = vrot.slane %v400_v24, 2  ;;  %v408_v28 = vpop.permute.xlu1 %407 }
 0x124   : > { %v346_v30 = vadd.f32 %v345_v25, %v344_v23 }
 0x125   : > { %v402_v29 = vadd.f32 %v401_v26, %v400_v24 }
 0x126   : > { %v347_v33 = vmax.f32 %v346_v30, 0.0 }
 0x127   : > { %v403_v31 = vrot.slane %v402_v29, 1 }
 0x128   : > { %v361_v32 = vpop.permute.xlu1 %360  ;;  %v368_v38 = vmul.f32 %v351_v21, %v347_v33  ;;  %v369_v41 = vmul.f32 %v356_v36, %v347_v33  ;;  %v371_v52 = vmul.f32 %v366_v44, %v347_v33 }
 0x129   : > { %v404_v35 = vadd.f32 %v403_v31, %v402_v29  ;;  %v370_v45 = vmul.f32 %v361_v32, %v347_v33 }
 0x12b   : > { %v405_v37 = vmax.f32 %v404_v35, 0.0 }
 0x12d   : > { %v423_v39 = vmul.f32 %v412_v27, %v405_v37  ;;  %v422_v40 = vmul.f32 %v408_v28, %v405_v37  ;;  %v416_v42 = vpop.permute.xlu1 %415 }
 0x12e   : > { %v424_v43 = vmul.f32 %v416_v42, %v405_v37 }
 0x12f   : > { %v426_v46 = vadd.f32 %v422_v40, %v368_v38  ;;  %v427_v47 = vadd.f32 %v423_v39, %v369_v41  ;;  %v1980_v41 = vmov 1966171168  }
 0x130   : > { %v428_v51 = vadd.f32 %v424_v43, %v370_v45  ;;  %v511_v42 = vunpack.c.l.s4 %v1980_v41  ;;  %v568_v41 = vstv %s2318_s2  ;;  %s2425_s2 = sld [smem:[#allocation7 + $0x36]] }
 0x131   : > { %v420_v48 = vpop.permute.xlu1 %419  ;;  %v430_v49 = vsel %vm333_vm1, %v426_v46, 0.0  ;;  %v433_v50 = vsel %vm333_vm1, %v427_v47, 0.0 }
 0x132   : > { %v425_v53 = vmul.f32 %v420_v48, %v405_v37  ;;  %431 = vadd.xlane.f32.xlu1 %v430_v49  ;;  %434 = vadd.xlane.f32.xlu0 %v433_v50  ;;  %v436_v55 = vsel %vm333_vm1, %v428_v51, 0.0  ;;  %v512_v51 = vunpack.c.0.s8 %v511_v42 }
 0x134   : > { %v429_v54 = vadd.f32 %v425_v53, %v371_v52  ;;  %v2280_v52 = vshrl.u32 %v294_v34, 7  ;;  %v745_v34 = vstv %s2283_s13  ;;  %s2342_s13 = sld [smem:[#allocation7 + $0x9]] }
 0x136   : > { %437 = vadd.xlane.f32.xlu0 %v436_v55  ;;  %v439_v56 = vsel %vm333_vm1, %v429_v54, 0.0 }
 0x137   : > { %440 = vadd.xlane.f32.xlu1 %v439_v56 }
 0x1bf   : > { %v432_v58 = vpop.xlane.xlu1 %431  ;;  %v435_v59 = vpop.xlane.xlu0 %434 }
 0x1c0   : > { %v442_v60 = vmul.f32 0.5, %v432_v58  ;;  %v443_v61 = vmul.f32 0.5, %v435_v59 }
 0x1c2   : > { %1846 = vtanh.f32 %v442_v60 }
 0x1c3   : > { %1848 = vtanh.f32 %v443_v61  ;;  %v438_v62 = vpop.xlane.xlu0 %437  ;;  %v515_v61 = vsub.s32 %v512_v51, %v2280_v52  ;;  %v843_v51 = vstv %s2342_s13  ;;  %s1678_s13 = sld [smem:[#allocation7 + $0x5c]] }
 0x1c4   : > { %v444_v63 = vmul.f32 0.5, %v438_v62  ;;  %v441_v3 = vpop.xlane.xlu1 %440 }
 0x1c5   : > { %v445_v7 = vmul.f32 0.5, %v441_v3 }
 0x1c6   : > { %1850 = vtanh.f32 %v444_v63 }
 0x1c7   : > { %1852 = vtanh.f32 %v445_v7 }
 0x1cc   : > { %v1847_v8 = vpop.eup %1846 }
 0x1cd   : > { %v1849_v9 = vpop.eup %1848  ;;  %v450_v10 = vadd.f32 1.0, %v1847_v8 }
 0x1ce   : > { %v451_v13 = vadd.f32 1.0, %v1849_v9 }
 0x1cf   : > { %v454_v14 = vmul.f32 0.5, %v450_v10 }
 0x1d0   : > { %v1851_v15 = vpop.eup %1850  ;;  %v455_v16 = vmul.f32 0.5, %v451_v13 }
 0x1d1   : > { %v1853_v17 = vpop.eup %1852  ;;  %v2240_v18 = vmul.f32 %v454_v14, %v2170_v2  ;;  %v2243_v19 = vmul.f32 %v454_v14, %v2174_v4  ;;  %v452_v20 = vadd.f32 1.0, %v1851_v15 }
 0x1d2   : > { %v2246_v21 = vmul.f32 %v455_v16, %v2176_v5  ;;  %v2249_v22 = vmul.f32 %v455_v16, %v2178_v6  ;;  %v453_v23 = vadd.f32 1.0, %v1853_v17  ;;  %v603_v16 = vstv %s2285_s25  ;;  %s2348_s25 = sld [smem:[#allocation7 + $0x3a]] }
 0x1d3   : > { %v456_v24 = vmul.f32 0.5, %v452_v20 }
 0x1d4   : > { %3025 = vst [vmem:[#allocation22_spill] sm:$0xff] %v2249_v22  ;;  %v457_v25 = vmul.f32 0.5, %v453_v23  ;;  %v466_v26 = vadd.f32 %v2246_v21, %v2240_v18  ;;  %v475_v2 = vadd.f32 %v2249_v22, %v2243_v19 }
 0x1d5   : > { %v2256_v27 = vmul.f32 %v456_v24, %v2166_v0  ;;  %v2259_v4 = vmul.f32 %v456_v24, %v2168_v1 }
 0x1d6   : > { %v2262_v5 = vmul.f32 %v457_v25, %v2186_v11  ;;  %v2265_v6 = vmul.f32 %v457_v25, %v2188_v12  ;;  %v1140_v25 = vstv %s2287_s8  ;;  %s2358_s8 = sld [smem:[#allocation7 + $0x32]] }
 0x1d7   : > { %3026 = vst [vmem:[#allocation23_spill] sm:$0xff] %v2256_v27  ;;  %3027 = vst [vmem:[#allocation24_spill] sm:$0xff] %v2259_v4  ;;  %v467_v28 = vadd.f32 %v466_v26, %v2256_v27  ;;  %v476_v29 = vadd.f32 %v475_v2, %v2259_v4  ;;  %v487_v30 = vmax.f32 %v2240_v18, %v2256_v27  ;;  %v880_v26 = vstv %s2289_s9  ;;  %s2364_s9 = sld [smem:[#allocation7 + $0x4]] }
 0x1d8   : > { %3028 = vst [vmem:[#allocation25_spill] sm:$0xff] %v2262_v5  ;;  %3029 = vst [vmem:[#allocation26_spill] sm:$0xff] %v2265_v6  ;;  %v496_v0 = vmax.f32 %v2243_v19, %v2259_v4  ;;  %v488_v1 = vmax.f32 %v2246_v21, %v2262_v5  ;;  %v497_v11 = vmax.f32 %v2249_v22, %v2265_v6 }
 0x1d9   : > { %v468_v31 = vadd.f32 %v467_v28, %v2262_v5  ;;  %v477_v12 = vadd.f32 %v476_v29, %v2265_v6  ;;  %v785_v29 = vstv %s2292_s12  ;;  %s2380_s12 = sld [smem:[#allocation7 + $0x6]] }
 0x1da   : > { %v489_v32 = vmax.f32 %v487_v30, %v488_v1  ;;  %v498_v33 = vmax.f32 %v496_v0, %v497_v11  ;;  %v1275_v30 = vstv %s2294_s23  ;;  %v1180_v0 = vstv %s2296_s26  ;;  %s2382_s23 = sld [smem:[#allocation7 + $0x37]]  ;;  %s2388_s26 = sld [smem:[#allocation7]] }
 0x1db   : > { %v469_v35 = vrot.slane %v468_v31, 4  ;;  %v478_v36 = vrot.slane %v477_v12, 4  ;;  %v1017_v1 = vstv %s2298_s28  ;;  %v1450_v11 = vstv %s2300_s11  ;;  %s2390_s28 = sld [smem:[#allocation7 + $0x31]]  ;;  %s2396_s11 = sld [smem:[#allocation7 + $0x2]] }
 0x1dc   : > { %v490_v37 = vrot.slane %v489_v32, 4  ;;  %v499_v38 = vrot.slane %v498_v33, 4  ;;  %3031 = sst [smem:[#allocation28_spill]] %s2358_s8  ;;  %s2374_s8 = sld [smem:[#allocation7 + $0x34]] }
 0x1dd   : > { %v470_v39 = vadd.f32 %v469_v35, %v468_v31  ;;  %v479_v40 = vadd.f32 %v478_v36, %v477_v12  ;;  %v1410_v31 = vstv %s2302_s10  ;;  %v725_v12 = vstv %s2304_s16  ;;  %s3034_s10 = sld [smem:[#allocation28_spill]]  ;;  %s1982_s16 = smov 64  }
 0x1de   : > { %v491_v43 = vmax.f32 %v489_v32, %v490_v37  ;;  %v500_v44 = vmax.f32 %v498_v33, %v499_v38  ;;  %v648_v32 = vstv %s2306_s17  ;;  %v1120_v33 = vstv %s2308_s29  ;;  %s1660_s17 = sld [smem:[#allocation7 + $0x4d]] }
 0x1df   : > { %v471_v45 = vrot.slane %v470_v39, 2  ;;  %v480_v46 = vrot.slane %v479_v40, 2  ;;  %v920_v35 = vstv %s2310_s7  ;;  %v765_v36 = vstv %s2312_s15  ;;  %s2398_s15 = sld [smem:[#allocation7 + $0x33]]  ;;  %s1689_s29 = sld [smem:[#allocation7 + $0x25]] }
 0x1e0   : > { %v492_v47 = vrot.slane %v491_v43, 2  ;;  %v501_v48 = vrot.slane %v500_v44, 2  ;;  %v1315_v37 = vstv %s2314_s0  ;;  %s3033_s0 = sld [smem:[#allocation27_spill]]  ;;  %s1688_s7 = sld [smem:[#allocation7 + $0x4f]] }
 0x1e1   : > { %v472_v49 = vadd.f32 %v471_v45, %v470_v39  ;;  %v481_v50 = vadd.f32 %v480_v46, %v479_v40  ;;  %v565_v40 = vstv %s2316_s1  ;;  %v978_v45 = vstv %s2326_s20  ;;  %s2408_s1 = sld [smem:[#allocation7 + $0x5]]  ;;  %s1713_s20 = sld [smem:[#allocation7 + $0x19]] }
 0x1e2   : > { %v493_v53 = vmax.f32 %v491_v43, %v492_v47  ;;  %v502_v54 = vmax.f32 %v500_v44, %v501_v48  ;;  %v1103_v43 = vstv %s2320_s4  ;;  %v1106_v44 = vstv %s2322_s27  ;;  %s2457_s4 = sld [smem:[#allocation7 + $0x57]]  ;;  %s1698_s27 = sld [smem:[#allocation7 + $0x42]] }
 0x1e3   : > { %v473_v55 = vrot.slane %v472_v49, 1  ;;  %v482_v56 = vrot.slane %v481_v50, 1  ;;  %v981_v46 = vstv %s2328_s19  ;;  %v1373_v47 = vstv %s2330_s24  ;;  %s1684_s19 = sld [smem:[#allocation7 + $0x41]]  ;;  %s1699_s24 = sld [smem:[#allocation7 + $0x18]] }
 0x1e4   : > { %v494_v57 = vrot.slane %v493_v53, 1  ;;  %v503_v58 = vrot.slane %v502_v54, 1  ;;  %v1376_v48 = vstv %s2332_s21  ;;  %s1726_s21 = sld [smem:[#allocation7 + $0x44]] }
 0x1e5   : > { %v474_v59 = vadd.f32 %v473_v55, %v472_v49  ;;  %v483_v60 = vadd.f32 %v482_v56, %v481_v50  ;;  %v708_v49 = vstv %s2336_s6  ;;  %v711_v50 = vstv %s2340_s18  ;;  %s2485_s18 = sld [smem:[#allocation7 + $0x15]] }
 0x1e6   : > { %v495_v62 = vmax.f32 %v493_v53, %v494_v57  ;;  %v504_v63 = vmax.f32 %v502_v54, %v503_v58  ;;  %v846_v53 = vstv %s2348_s25  ;;  %v1238_v56 = vstv %s2352_s5  ;;  %s2483_s5 = sld [smem:[#allocation7 + $0x3f]]  ;;  %s1740_s6 = sld [smem:[#allocation7 + $0x45]] }
 0x1e7   : > { %v485_v3 = vmul.f32 0.03125, %v474_v59  ;;  %v486_v7 = vmul.f32 0.03125, %v483_v60  ;;  %v1241_v57 = vstv %s2354_s14  ;;  %v700_v58 = vstv %s3033_s0  ;;  %s1661_s14 = sld [smem:[#allocation7 + $0x23]]  ;;  %s1730_s25 = sld [smem:[#allocation7 + $0x52]] }
 0x1e8   : > { %v533_v8 = vcombine.low %v495_v62, %v504_v63  ;;  %v703_v59 = vstv %s3034_s10  ;;  %v1095_v60 = vstv %s2364_s9  ;;  %v970_v62 = vstv %s2372_s3  ;;  %s2455_s3 = sld [smem:[#allocation7 + $0x51]]  ;;  %s1671_s9 = sld [smem:[#allocation7 + $0x16]] }
 0x1e9   : > { %v509_v9 = vcombine.low %v485_v3, %v486_v7  ;;  %v973_v63 = vstv %s2374_s8  ;;  %v1365_v3 = vstv %s2380_s12  ;;  %v1368_v7 = vstv %s2382_s23  ;;  %s1720_s8 = sld [smem:[#allocation7 + $0x5f]]  ;;  %s1731_s12 = sld [smem:[#allocation7 + $0x28]] }
 0x1ea   : > { %v540_v10 = vrot.slane %v533_v8, %v515_v61  ;;  %v557_v8 = vstv %s2388_s26  ;;  %s1685_s23 = sld [smem:[#allocation7 + $0x17]]  ;;  %s1703_s26 = sld [smem:[#allocation7 + $0x26]] }
 0x1eb   : > { %v516_v13 = vrot.slane %v509_v9, %v515_v61  ;;  %v560_v9 = vstv %s2390_s28  ;;  %s1983_s28 = smov 32   ;;  %s1675_s0 = sld [smem:[#allocation7 + $0x24]] }
 0x1ec   : > { %v547_v14 = vrot.slane %v540_v10, %v515_v61  ;;  %s1669_s10 = sld [smem:[#allocation7 + $0xf]] }
 0x1ed   : > { %v523_v15 = vrot.slane %v516_v13, %v515_v61 }
 0x1ee   : > { %550 = vst.msk [vmem:[#allocation2 + $0x3] ss:$2 sm:$0x3] %vm527_vm2, %v547_v14 }
 0x1ef   : > { %530 = vst.msk [vmem:[#allocation2 + $0x2] ss:$2 sm:$0x3] %vm527_vm2, %v523_v15  ;;  %v835_v15 = vstv %s2396_s11  ;;  %s1727_s11 = sld [smem:[#allocation7 + $0x1a]] }
 0x1f5   : > { %v2334_v17 = vld [vmem:[#allocation2 + $0x1] ss:$2 sm:$0x7] }
 0x1f6   : > { %v746_v20 = vmul.f32 %v745_v34, %v2334_v17  ;;  %v604_v23 = vmul.f32 %v603_v16, %v2334_v17  ;;  %v2344_v24 = vld [vmem:[#allocation2 + $0x3] ss:$2 sm:$0x7]  ;;  %v881_v28 = vmul.f32 %v880_v26, %v2334_v17  ;;  %v2431_v10 = vld [vmem:[#allocation2] ss:$2 sm:$0x7]  ;;  %v838_v34 = vstv %s2398_s15 }
 0x1f7   : > { %v1141_v2 = vmul.f32 %v1140_v25, %v2344_v24  ;;  %v786_v38 = vmul.f32 %v785_v29, %v2344_v24  ;;  %v1276_v39 = vmul.f32 %v1275_v30, %v2344_v24  ;;  %v1005_v42 = vld [vmem:[#allocation2 + $0x3] ss:$2 sm:$0x3]  ;;  %v1181_v54 = vmul.f32 %v1180_v0, %v2344_v24  ;;  %s1745_s15 = sld [smem:[#allocation7 + $0x29]] }
 0x1f8   : > { %748 = vrot.lane.b32.xlu0 %v746_v20, %s2988_s30  ;;  %606 = vrot.lane.b32.xlu1 %v604_v23, %s2988_s30  ;;  %s2366_s30 = sld [smem:[#allocation7 + $0x35]]  ;;  %v1018_v55 = vmul.f32 %v1017_v1, %v1005_v42  ;;  %v1451_v13 = vmul.f32 %v1450_v11, %v2344_v24  ;;  %v1411_v14 = vmul.f32 %v1410_v31, %v2344_v24  ;;  %v1230_v29 = vstv %s2408_s1  ;;  %s1717_s1 = sld [smem:[#allocation7 + $0x27]] }
 0x1f9   : > { %v726_v16 = vmul.f32 %v725_v12, %v2334_v17  ;;  %v649_v20 = vmul.f32 %v648_v32, %v2344_v24  ;;  %v1121_v23 = vmul.f32 %v1120_v33, %v2334_v17  ;;  %v921_v25 = vmul.f32 %v920_v35, %v2344_v24 }
 0x1fa   : > { %v766_v26 = vmul.f32 %v765_v36, %v2344_v24  ;;  %v566_v30 = vmul.f32 %v565_v40, %v2431_v10  ;;  %v1104_v0 = vmul.f32 %v1103_v43, %v2431_v10  ;;  %v1107_v1 = vmul.f32 %v1106_v44, %v2334_v17 }
 0x1fb   : > { %v979_v11 = vmul.f32 %v978_v45, %v2431_v10  ;;  %v982_v31 = vmul.f32 %v981_v46, %v2334_v17  ;;  %v1374_v12 = vmul.f32 %v1373_v47, %v2431_v10  ;;  %v1377_v32 = vmul.f32 %v1376_v48, %v2334_v17 }
 0x1fc   : > { %1143 = vrot.lane.b32.xlu0 %v1141_v2, %s3032_s22  ;;  %883 = vrot.lane.b32.xlu1 %v881_v28, %s3032_s22  ;;  %v1316_v2 = vmul.f32 %v1315_v37, %v2344_v24  ;;  %v569_v28 = vmul.f32 %v568_v41, %v2334_v17  ;;  %v712_v33 = vmul.f32 %v711_v50, %v2334_v17  ;;  %v1233_v42 = vstv %s2425_s2  ;;  %s1711_s2 = sld [smem:[#allocation7 + $0x12]] }
 0x1fd   : > { %v2461_v36 = vadd.f32 %v1107_v1, %v1104_v0  ;;  %v709_v37 = vmul.f32 %v708_v49, %v2431_v10  ;;  %v2469_v40 = vadd.f32 %v1377_v32, %v1374_v12  ;;  %v847_v41 = vmul.f32 %v846_v53, %v2334_v17 }
 0x1fe   : > { %v1098_v61 = vstv %s2366_s30  ;;  %v2459_v35 = vadd.f32 %v569_v28, %v566_v30  ;;  %v1239_v44 = vmul.f32 %v1238_v56, %v2431_v10  ;;  %v1242_v45 = vmul.f32 %v1241_v57, %v2334_v17  ;;  %v2527_v28 = vld [vmem:[#allocation2 + $0x2] ss:$2 sm:$0x7]  ;;  %s1741_s30 = sld [smem:[#allocation7 + $0x1b]] }
 0x1ff   : > { %v2473_v43 = vadd.f32 %v712_v33, %v709_v37  ;;  %v701_v46 = vmul.f32 %v700_v58, %v2431_v10  ;;  %v704_v48 = vmul.f32 %v703_v59, %v2334_v17  ;;  %v1096_v49 = vmul.f32 %v1095_v60, %v2431_v10 }
 0x200   : > { %788 = vrot.lane.b32.xlu0 %v786_v38, %s1982_s16  ;;  %1278 = vrot.lane.b32.xlu1 %v1276_v39, %s3032_s22  ;;  %v844_v38 = vmul.f32 %v843_v51, %v2431_v10  ;;  %v2467_v39 = vadd.f32 %v982_v31, %v979_v11  ;;  %v1099_v50 = vmul.f32 %v1098_v61, %v2334_v17  ;;  %v1131_v30 = vstv %s1713_s20  ;;  %v1004_v31 = vld [vmem:[#allocation2 + $0x2] ss:$2 sm:$0x3]  ;;  %s1659_s20 = sld [smem:[#allocation7 + $0x1c]] }
 0x201   : > { %v2487_v51 = vadd.f32 %v1242_v45, %v1239_v44  ;;  %v971_v53 = vmul.f32 %v970_v62, %v2431_v10  ;;  %v2494_v56 = vadd.f32 %v704_v48, %v701_v46  ;;  %v1369_v58 = vmul.f32 %v1368_v7, %v2334_v17 }
 0x202   : > { %v2478_v47 = vadd.f32 %v847_v41, %v844_v38  ;;  %v2496_v57 = vadd.f32 %v1099_v50, %v1096_v49  ;;  %v561_v60 = vmul.f32 %v560_v9, %v2334_v17  ;;  %v558_v61 = vmul.f32 %v557_v8, %v2431_v10 }
 0x203   : > { %v836_v62 = vmul.f32 %v835_v15, %v2431_v10  ;;  %v1057_v7 = vstv %s2457_s4  ;;  %v1132_v1 = vmul.f32 %v1131_v30, %v2527_v28  ;;  %v1255_v11 = vstv %s1726_s21  ;;  %s1697_s4 = sld [smem:[#allocation7 + $0x11]]  ;;  %s1692_s21 = sld [smem:[#allocation7 + $0x5d]] }
 0x204   : > { %1183 = vrot.lane.b32.xlu0 %v1181_v54, %s1982_s16  ;;  %1020 = vrot.lane.b32.xlu1 %v1018_v55, %s3032_s22  ;;  %v974_v54 = vmul.f32 %v973_v63, %v2334_v17  ;;  %v1366_v55 = vmul.f32 %v1365_v3, %v2431_v10  ;;  %v839_v3 = vmul.f32 %v838_v34, %v2334_v17  ;;  %v1008_v12 = vstv %s1699_s24  ;;  %s1687_s24 = sld [smem:[#allocation7 + $0x1e]] }
 0x205   : > { %v1058_v34 = vmul.f32 %v1057_v7, %v2344_v24  ;;  %v1256_v32 = vmul.f32 %v1255_v11, %v2334_v17  ;;  %v1009_v33 = vmul.f32 %v1008_v12, %v1004_v31  ;;  %v995_v37 = vstv %s1698_s27  ;;  %s1734_s27 = sld [smem:[#allocation7 + $0x60]] }
 0x206   : > { %v2499_v59 = vadd.f32 %v974_v54, %v971_v53  ;;  %v2504_v63 = vadd.f32 %v1369_v58, %v1366_v55  ;;  %v2515_v8 = vadd.f32 %v839_v3, %v836_v62  ;;  %v1401_v38 = vstv %s1741_s30  ;;  %s1729_s30 = sld [smem:[#allocation7 + $0x21]] }
 0x207   : > { %v996_v41 = vmul.f32 %v995_v37, %v2334_v17  ;;  %v1390_v44 = vstv %s1740_s6  ;;  %v639_v45 = vstv %s1661_s14  ;;  %v628_v49 = vstv %s1660_s17  ;;  %s1706_s6 = sld [smem:[#allocation7 + $0x5e]]  ;;  %s1701_s14 = sld [smem:[#allocation7 + $0x1f]] }
 0x208   : > { %1453 = vrot.lane.b32.xlu0 %v1451_v13, %s1982_s16  ;;  %1413 = vrot.lane.b32.xlu1 %v1411_v14, %s3032_s22  ;;  %v1231_v13 = vmul.f32 %v1230_v29, %v2431_v10  ;;  %v1234_v14 = vmul.f32 %v1233_v42, %v2334_v17  ;;  %v860_v29 = vstv %s1684_s19  ;;  %v1402_v42 = vmul.f32 %v1401_v38, %v2527_v28  ;;  %s1664_s19 = sld [smem:[#allocation7 + $0x5b]]  ;;  %s1748_s17 = sld [smem:[#allocation7 + $0x61]] }
 0x209   : > { %v861_v0 = vmul.f32 %v860_v29, %v2334_v17  ;;  %v1391_v46 = vmul.f32 %v1390_v44, %v2334_v17  ;;  %v640_v48 = vmul.f32 %v639_v45, %v2527_v28  ;;  %v911_v50 = vstv %s1689_s29  ;;  %s1743_s29 = sld [smem:[#allocation7 + $0x22]] }
 0x20a   : > { %v2517_v9 = vadd.f32 %v1234_v14, %v1231_v13  ;;  %v629_v53 = vmul.f32 %v628_v49, %v2344_v24  ;;  %v912_v54 = vmul.f32 %v911_v50, %v2527_v28  ;;  %v900_v55 = vstv %s1688_s7  ;;  %s1663_s7 = sld [smem:[#allocation7 + $0x2a]] }
 0x20b   : > { %v805_v58 = vstv %s1678_s13  ;;  %v1200_v62 = vstv %s1720_s8  ;;  %v736_v14 = vstv %s1671_s9  ;;  %v1441_v29 = vstv %s1745_s15  ;;  %s1655_s13 = sld [smem:[#allocation7 + $0xe]]  ;;  %s1683_s8 = sld [smem:[#allocation7 + $0x10]] }
 0x20c   : > { %728 = vrot.lane.b32.xlu0 %v726_v16, %s3032_s22  ;;  %651 = vrot.lane.b32.xlu1 %v649_v20, %s1982_s16  ;;  %v1160_v16 = vstv %s2455_s3  ;;  %v2511_v20 = vadd.f32 %v561_v60, %v558_v61  ;;  %v806_v60 = vmul.f32 %v805_v58, %v2344_v24  ;;  %v1295_v61 = vstv %s1730_s25  ;;  %s1702_s3 = sld [smem:[#allocation7 + $0x50]]  ;;  %s1691_s25 = sld [smem:[#allocation7 + $0x2c]] }
 0x20d   : > { %v1161_v15 = vmul.f32 %v1160_v16, %v2344_v24  ;;  %v1296_v3 = vmul.f32 %v1295_v61, %v2344_v24  ;;  %v1201_v13 = vmul.f32 %v1200_v62, %v2344_v24  ;;  %v1306_v16 = vstv %s1731_s12  ;;  %s1733_s9 = sld [smem:[#allocation7 + $0x2f]]  ;;  %s1725_s12 = sld [smem:[#allocation7 + $0x13]] }
 0x20e   : > { %v737_v7 = vmul.f32 %v736_v14, %v2431_v10  ;;  %v716_v11 = vstv %s1669_s10  ;;  %s1715_s15 = sld [smem:[#allocation7 + $0x20]]  ;;  %s1719_s10 = sld [smem:[#allocation7 + $0x2e]] }
 0x20f   : > { %v717_v12 = vmul.f32 %v716_v11, %v2431_v10 }
 0x210   : > { %1123 = vrot.lane.b32.xlu0 %v1121_v23, %s3032_s22  ;;  %923 = vrot.lane.b32.xlu1 %v921_v25, %s1982_s16  ;;  %v583_v23 = vstv %s2483_s5  ;;  %v594_v25 = vstv %s2485_s18  ;;  %s1744_s5 = sld [smem:[#allocation7 + $0x53]]  ;;  %s1739_s18 = sld [smem:[#allocation7 + $0x14]] }
 0x214   : > { %768 = vrot.lane.b32.xlu0 %v766_v26, %s1982_s16  ;;  %1318 = vrot.lane.b32.xlu1 %v1316_v2, %s1982_s16  ;;  %v584_v26 = vmul.f32 %v583_v23, %v2334_v17  ;;  %v595_v2 = vmul.f32 %v594_v25, %v2431_v10  ;;  %v901_v17 = vmul.f32 %v900_v55, %v2344_v24  ;;  %v1048_v23 = vstv %s1703_s26  ;;  %s1673_s26 = sld [smem:[#allocation7 + $0x1d]] }
 0x218   : > { %1163 = vrot.lane.b32.xlu0 %v1161_v15, %s1982_s16  ;;  %1060 = vrot.lane.b32.xlu1 %v1058_v34, %s1982_s16  ;;  %v1307_v15 = vmul.f32 %v1306_v16, %v2527_v28  ;;  %v871_v34 = vstv %s1685_s23  ;;  %s1705_s23 = sld [smem:[#allocation7 + $0x2d]] }
 0x219   : > { %v872_v25 = vmul.f32 %v871_v34, %v2431_v10 }
 0x21c   : > { %586 = vrot.lane.b32.xlu1 %v584_v26, %s3032_s22  ;;  %597 = vrot.lane.b32.xlu0 %v595_v2, %s3032_s22  ;;  %v1049_v26 = vmul.f32 %v1048_v23, %v2527_v28  ;;  %v1266_v2 = vstv %s1727_s11  ;;  %s1747_s11 = sld [smem:[#allocation7 + $0x30]] }
 0x21d   : > { %v1267_v30 = vmul.f32 %v1266_v2, %v2527_v28 }
 0x220   : > { %863 = vrot.lane.b32.xlu1 %v861_v0, %s3032_s22  ;;  %1134 = vrot.lane.b32.xlu0 %v1132_v1, %s3032_s22  ;;  %v1442_v0 = vmul.f32 %v1441_v29, %v2527_v28  ;;  %v776_v1 = vstv %s1675_s0  ;;  %s1677_s0 = sld [smem:[#allocation7 + $0x2b]] }
 0x221   : > { %v777_v31 = vmul.f32 %v776_v1, %v2527_v28 }
 0x224   : > { %1258 = vrot.lane.b32.xlu1 %v1256_v32, %s3032_s22  ;;  %1011 = vrot.lane.b32.xlu0 %v1009_v33, %s3032_s22  ;;  %v1171_v32 = vstv %s1717_s1  ;;  %v1111_v33 = vstv %s1711_s2  ;;  %s1987_s1 = smov 50   ;;  %s1988_s2 = smov 46  }
 0x225   : > { %v1172_v37 = vmul.f32 %v1171_v32, %v2527_v28  ;;  %v1112_v38 = vmul.f32 %v1111_v33, %v2431_v10  ;;  %v931_v32 = vstv %s1691_s25  ;;  %s3056_s25 = sld [smem:[#allocation19_spill]] }
 0x228   : > { %998 = vrot.lane.b32.xlu1 %v996_v41, %s3032_s22  ;;  %1404 = vrot.lane.b32.xlu0 %v1402_v42, %s3032_s22  ;;  %v1037_v41 = vstv %s1702_s3  ;;  %v986_v42 = vstv %s1697_s4  ;;  %s1989_s3 = smov 47   ;;  %s1990_s4 = smov 48  }
 0x229   : > { %v1038_v44 = vmul.f32 %v1037_v41, %v2344_v24  ;;  %v987_v45 = vmul.f32 %v986_v42, %v2431_v10  ;;  %v1326_v42 = vstv %s1733_s9 }
 0x22b   : > { %p3060_p12 = scmp.ne.s32.totalorder %s3056_s25, 0 }
 0x22c   : > { %1393 = vrot.lane.b32.xlu1 %v1391_v46, %s3032_s22  ;;  %642 = vrot.lane.b32.xlu0 %v640_v48, %s1982_s16  ;;  %v1430_v46 = vstv %s1744_s5  ;;  %v1381_v48 = vstv %s1739_s18  ;;  %s1991_s5 = smov 45  }
 0x22d   : > { %v1431_v49 = vmul.f32 %v1430_v46, %v2344_v24  ;;  %v1382_v50 = vmul.f32 %v1381_v48, %v2431_v10  ;;  %v1327_v48 = vmul.f32 %v1326_v42, %v2527_v28 }
 0x230   : > { %631 = vrot.lane.b32.xlu1 %v629_v53, %s1982_s16  ;;  %914 = vrot.lane.b32.xlu0 %v912_v54, %s1982_s16  ;;  %v669_v53 = vstv %s1664_s19  ;;  %v618_v54 = vstv %s1659_s20  ;;  %s3035_s20 = sld [smem:[#allocation32_spill]] }
 0x231   : > { %v670_v55 = vmul.f32 %v669_v53, %v2344_v24  ;;  %v619_v58 = vmul.f32 %v618_v54, %v2527_v28  ;;  %v756_v53 = vstv %s1673_s26 }
 0x234   : > { %903 = vrot.lane.b32.xlu1 %v901_v17, %s1982_s16  ;;  %808 = vrot.lane.b32.xlu0 %v806_v60, %s1983_s28  ;;  %v940_v17 = vstv %s1692_s21  ;;  %v891_v60 = vstv %s1687_s24  ;;  %s3050_s21 = sld [smem:[#allocation16_spill]]  ;;  %s3051_s24 = sld [smem:[#allocation21_spill]] }
 0x235   : > { %v941_v61 = vmul.f32 %v940_v17, %v2344_v24  ;;  %v892_v62 = vmul.f32 %v891_v60, %v2527_v28  ;;  %v757_v17 = vmul.f32 %v756_v53, %v2527_v28  ;;  %v1461_v60 = vstv %s1747_s11 }
 0x238   : > { %1298 = vrot.lane.b32.xlu1 %v1296_v3, %s1982_s16  ;;  %1203 = vrot.lane.b32.xlu0 %v1201_v13, %s1983_s28  ;;  %v1335_v3 = vstv %s1734_s27  ;;  %v1286_v13 = vstv %s1729_s30 }
 0x239   : > { %v1336_v14 = vmul.f32 %v1335_v3, %v2344_v24  ;;  %v1287_v16 = vmul.f32 %v1286_v13, %v2527_v28  ;;  %v1462_v3 = vmul.f32 %v1461_v60, %v2527_v28 }
 0x23a   : > { %s1755_s27 = sshll.u32 %s3050_s21, 10  ;;  %s3052_s30 = sshll.u32 %s3051_s24, 6 }
 0x23c   : > { %739 = vrot.lane.b32.xlu1 %v737_v7, %s3032_s22  ;;  %1309 = vrot.lane.b32.xlu0 %v1307_v15, %s1982_s16  ;;  %v1077_v7 = vstv %s1706_s6  ;;  %v1028_v15 = vstv %s1701_s14  ;;  %s256_s6 = scalar_lea.vmem [#allocation8], %s3052_s30 }
 0x23d   : > { %v1078_v34 = vmul.f32 %v1077_v7, %v2344_v24  ;;  %v1029_v23 = vmul.f32 %v1028_v15, %v2527_v28  ;;  %s1556_s14 = sshll.u32 %s256_s6, 4  ;;  %s2917_s14 = int_to_ptr.vmem [resolvable:$true] %s1556_s14 }
 0x23e   : > { %s1901_s9 = scalar_lea.vmem %s2917_s14, 1024 }
 0x23f   : > { %p1902_p5 = scmp.ne.s32.totalorder %s2917_s14, %s1901_s9 }
 0x240   : > { %874 = vrot.lane.b32.xlu1 %v872_v25, %s3032_s22  ;;  %1051 = vrot.lane.b32.xlu0 %v1049_v26, %s1982_s16  ;;  %v1470_v25 = vstv %s1748_s17  ;;  %v1421_v26 = vstv %s1743_s29 }
 0x241   : > { %v1471_v2 = vmul.f32 %v1470_v25, %v2344_v24  ;;  %v1422_v29 = vmul.f32 %v1421_v26, %v2527_v28  ;;  %v851_v24 = vstv %s1683_s8  ;;  %s1543_s8 = scalar_lea.sflag [#allocation5], %s3051_s24  ;;  %p1903_p8 = pnand %p1902_p5, %p3060_p12 }
 0x242   : > { %v852_v41 = vmul.f32 %v851_v24, %v2431_v10 }
 0x243   : > { %p1904_p9 = pneg %p1903_p8 }
 0x244   : > { %1269 = vrot.lane.b32.xlu1 %v1267_v30, %s3032_s22  ;;  %1444 = vrot.lane.b32.xlu0 %v1442_v0, %s1982_s16  ;;  %v659_v30 = vstv %s1663_s7  ;;  %v573_v0 = vstv %s1655_s13  ;;  %s3054_s7 = sld [smem:[#allocation34_spill]] }
 0x248   : > { %779 = vrot.lane.b32.xlu1 %v777_v31, %s1982_s16  ;;  %719 = vrot.lane.b32.xlu0 %v717_v12, %s3032_s22  ;;  %v660_v31 = vmul.f32 %v659_v30, %v2527_v28  ;;  %v574_v12 = vmul.f32 %v573_v0, %v2431_v10 }
 0x24a   : > { %s2915_s13 = scalar_lea.hbm %s3054_s7, %s1755_s27 }
 0x24c   : > { %1174 = vrot.lane.b32.xlu1 %v1172_v37, %s1982_s16  ;;  %1114 = vrot.lane.b32.xlu0 %v1112_v38, %s3032_s22  ;;  %v932_v38 = vmul.f32 %v931_v32, %v2527_v28 }
 0x250   : > { %1040 = vrot.lane.b32.xlu1 %v1038_v44, %s1982_s16  ;;  %989 = vrot.lane.b32.xlu0 %v987_v45, %s3032_s22  ;;  %v1246_v44 = vstv %s1725_s12  ;;  %s1992_s12 = smov [#allocation8]  }
 0x254   : > { %1433 = vrot.lane.b32.xlu1 %v1431_v49, %s1982_s16  ;;  %1384 = vrot.lane.b32.xlu0 %v1382_v50, %s3032_s22  ;;  %v1247_v49 = vmul.f32 %v1246_v44, %v2431_v10  ;;  %v1068_v50 = vstv %s1705_s23  ;;  %s1905_s23 = sshll.u32 %s1992_s12, 4  ;;  %s1906_s23 = int_to_ptr.vmem [resolvable:$false] %s1905_s23 }
 0x255   : > { %s1907_s26 = scalar_lea.vmem %s1906_s23, 2048  ;;  %p1908_p10 = scmp.lt.s32.totalorder %s2917_s14, %s1906_s23 }
 0x256   : > { %p1909_p1 = scmp.lt.s32.totalorder %s1907_s26, %s1901_s9 }
 0x258   : > { %672 = vrot.lane.b32.xlu1 %v670_v55, %s1983_s28  ;;  %621 = vrot.lane.b32.xlu0 %v619_v58, %s1982_s16  ;;  %v1069_v58 = vmul.f32 %v1068_v50, %v2527_v28  ;;  %p1910_p4 = por %p1909_p1, %p1908_p10 }
 0x25a   : > { %p1911_p11 = pnand %p1910_p4, %p1904_p9 }
 0x25c   : > { %943 = vrot.lane.b32.xlu1 %v941_v61, %s1983_s28  ;;  %894 = vrot.lane.b32.xlu0 %v892_v62, %s1982_s16  ;;  %v1151_v61 = vstv %s1715_s15 }
 0x25d   : > { %v1152_v13 = vmul.f32 %v1151_v61, %v2527_v28 }
 0x260   : > { %1338 = vrot.lane.b32.xlu1 %v1336_v14, %s1983_s28  ;;  %1289 = vrot.lane.b32.xlu0 %v1287_v16, %s1982_s16  ;;  %v796_v14 = vstv %s1677_s0 }
 0x261   : > { %v797_v15 = vmul.f32 %v796_v14, %v2527_v28 }
 0x264   : > { %1080 = vrot.lane.b32.xlu1 %v1078_v34, %s1983_s28  ;;  %1031 = vrot.lane.b32.xlu0 %v1029_v23, %s1982_s16  ;;  %v1191_v34 = vstv %s1719_s10 }
 0x265   : > { %v1192_v26 = vmul.f32 %v1191_v34, %v2527_v28 }
 0x268   : > { %1473 = vrot.lane.b32.xlu1 %v1471_v2, %s1983_s28  ;;  %1424 = vrot.lane.b32.xlu0 %v1422_v29, %s1982_s16 }
 0x26a   : > { %v2606_v1 = vpop.permute.xlu0 %748  ;;  %v2608_v11 = vpop.permute.xlu1 %606 }
 0x26c   : > { %662 = vrot.lane.b32.xlu0 %v660_v31, %s1983_s28  ;;  %576 = vrot.lane.b32.xlu1 %v574_v12, %s3032_s22 }
 0x26e   : > { %v1144_v33 = vpop.permute.xlu0 %1143  ;;  %v2614_v37 = vpop.permute.xlu1 %883 }
 0x270   : > { %934 = vrot.lane.b32.xlu0 %v932_v38, %s1983_s28  ;;  %854 = vrot.lane.b32.xlu1 %v852_v41, %s3032_s22  ;;  %v1145_v38 = vrot.slane %v1144_v33, 7 }
 0x272   : > { %v2620_v45 = vpop.permute.xlu0 %788  ;;  %v2622_v46 = vpop.permute.xlu1 %1278  ;;  %v1146_v50 = vsel %vm579_vm3, %v1145_v38, %v1144_v33 }
 0x274   : > { %1329 = vrot.lane.b32.xlu0 %v1327_v48, %s1983_s28  ;;  %1249 = vrot.lane.b32.xlu1 %v1247_v49, %s3032_s22  ;;  %s1984_s22 = smov 112  }
 0x276   : > { %v2628_v54 = vpop.permute.xlu0 %1183  ;;  %v1021_v55 = vpop.permute.xlu1 %1020 }
 0x277   : > { %v1022_v53 = vrot.slane %v1021_v55, 7 }
 0x278   : > { %1071 = vrot.lane.b32.xlu0 %v1069_v58, %s1983_s28  ;;  %759 = vrot.lane.b32.xlu1 %v757_v17, %s1982_s16 }
 0x27a   : > { %v2634_v10 = vpop.permute.xlu0 %1453  ;;  %v1414_v62 = vpop.permute.xlu1 %1413 }
 0x27b   : > { %v1415_v34 = vrot.slane %v1414_v62, 7 }
 0x27c   : > { %1464 = vrot.lane.b32.xlu0 %v1462_v3, %s1983_s28  ;;  %1154 = vrot.lane.b32.xlu1 %v1152_v13, %s1982_s16  ;;  %s1985_s16 = smov 51  }
 0x27e   : > { %v2640_v16 = vpop.permute.xlu0 %728  ;;  %v652_v7 = vpop.permute.xlu1 %651 }
 0x280   : > { %799 = vrot.lane.b32.xlu1 %v797_v15, %s1983_s28  ;;  %v1023_v15 = vsel %vm579_vm3, %v1022_v53, %v1021_v55 }
 0x282   : > { %v2644_v23 = vpop.permute.xlu0 %1123  ;;  %v2646_v25 = vpop.permute.xlu1 %923 }
 0x284   : > { %1194 = vrot.lane.b32.xlu1 %v1192_v26, %s1983_s28  ;;  %s1986_s28 = smov 49  }
 0x286   : > { %v2650_v2 = vpop.permute.xlu0 %768  ;;  %v2652_v29 = vpop.permute.xlu1 %1318 }
 0x28a   : > { %v2654_v30 = vpop.permute.xlu0 %1163  ;;  %v2656_v0 = vpop.permute.xlu1 %1060 }
 0x28e   : > { %v2658_v31 = vpop.permute.xlu1 %586  ;;  %v598_v12 = vpop.permute.xlu0 %597 }
 0x28f   : > { %v599_v28 = vrot.slane %v598_v12, 1 }
 0x291   : > { %v600_v60 = vsel %vm579_vm3, %v598_v12, %v599_v28 }
 0x292   : > { %v2660_v32 = vpop.permute.xlu1 %863  ;;  %v1135_v24 = vpop.permute.xlu0 %1134  ;;  %v602_v33 = vadd.f32 %v600_v60, %v2459_v35 }
 0x293   : > { %v1136_v41 = vrot.slane %v1135_v24, 7 }
 0x295   : > { %v1137_v42 = vsel %vm579_vm3, %v1136_v41, %v1135_v24 }
 0x296   : > { %v1139_v44 = vadd.f32 %v1137_v42, %v2461_v36  ;;  %v2664_v48 = vpop.permute.xlu1 %1258  ;;  %v1012_v49 = vpop.permute.xlu0 %1011  ;;  %v608_v36 = vrot.slane %v2608_v11, 1  ;;  %v1416_v42 = vsel %vm579_vm3, %v1415_v34, %v1414_v62  ;;  %v750_v34 = vrot.slane %v2606_v1, 1 }
 0x297   : > { %v1013_v58 = vrot.slane %v1012_v49, 7 }
 0x298   : > { %v2667_v17 = vadd.f32 %v1146_v50, %v1139_v44  ;;  %v609_v28 = vsel %vm579_vm3, %v2608_v11, %v608_v36  ;;  %v653_v44 = vrot.slane %v652_v7, 7 }
 0x299   : > { %v1014_v61 = vsel %vm579_vm3, %v1013_v58, %v1012_v49  ;;  %v611_v49 = vadd.f32 %v609_v28, %v602_v33 }
 0x29a   : > { %v1016_v3 = vadd.f32 %v1014_v61, %v2467_v39  ;;  %v2672_v13 = vpop.permute.xlu1 %998  ;;  %v1405_v14 = vpop.permute.xlu0 %1404 }
 0x29b   : > { %v1406_v26 = vrot.slane %v1405_v14, 7 }
 0x29c   : > { %v2677_v24 = vadd.f32 %v1023_v15, %v1016_v3 }
 0x29d   : > { %v1407_v38 = vsel %vm579_vm3, %v1406_v26, %v1405_v14 }
 0x29e   : > { %v1409_v12 = vadd.f32 %v1407_v38, %v2469_v40  ;;  %v2681_v41 = vpop.permute.xlu1 %1393  ;;  %v643_v39 = vpop.permute.xlu0 %642  ;;  %v654_v40 = vsel %vm624_vm4, %v653_v44, %v652_v7  ;;  %v885_v7 = vrot.slane %v2614_v37, 1  ;;  %v790_v38 = vrot.slane %v2620_v45, 7 }
 0x29f   : > { %v644_v55 = vrot.slane %v643_v39, 7  ;;  %v1280_v44 = vrot.slane %v2622_v46, 7 }
 0x2a0   : > { %v1418_v50 = vadd.f32 %v1416_v42, %v1409_v12  ;;  %v751_v42 = vsel %vm579_vm3, %v2606_v1, %v750_v34  ;;  %v925_v34 = vrot.slane %v2646_v25, 7 }
 0x2a1   : > { %v645_v35 = vsel %vm624_vm4, %v644_v55, %v643_v39  ;;  %v1281_v1 = vsel %vm579_vm3, %v1280_v44, %v2622_v46 }
 0x2a2   : > { %v647_v53 = vadd.f32 %v645_v35, %v611_v49  ;;  %v2687_v58 = vpop.permute.xlu1 %631  ;;  %v915_v60 = vpop.permute.xlu0 %914  ;;  %v926_v22 = vsel %vm624_vm4, %v925_v34, %v2646_v25  ;;  %v1125_v25 = vrot.slane %v2644_v23, 1 }
 0x2a3   : > { %v916_v49 = vrot.slane %v915_v60, 7 }
 0x2a4   : > { %v656_v61 = vadd.f32 %v654_v40, %v647_v53  ;;  %v886_v40 = vsel %vm579_vm3, %v2614_v37, %v885_v7  ;;  %v730_v37 = vrot.slane %v2640_v16, 1 }
 0x2a5   : > { %v917_v7 = vsel %vm624_vm4, %v916_v49, %v915_v60  ;;  %v1320_v60 = vrot.slane %v2652_v29, 7 }
 0x2a6   : > { %v2690_v3 = vpop.permute.xlu1 %903  ;;  %v2692_v14 = vpop.permute.xlu0 %808  ;;  %679 = vrot.lane.b32.xlu0 %v656_v61, %s1984_s22  ;;  %v791_v61 = vsel %vm624_vm4, %v790_v38, %v2620_v45 }
 0x2aa   : > { %v2695_v11 = vpop.permute.xlu1 %1298  ;;  %v2697_v62 = vpop.permute.xlu0 %1203 }
 0x2ae   : > { %v740_v36 = vpop.permute.xlu1 %739  ;;  %v1310_v15 = vpop.permute.xlu0 %1309 }
 0x2af   : > { %v741_v26 = vrot.slane %v740_v36, 1  ;;  %v1311_v38 = vrot.slane %v1310_v15, 7 }
 0x2b1   : > { %v742_v33 = vsel %vm579_vm3, %v740_v36, %v741_v26 }
 0x2b2   : > { %v744_v12 = vadd.f32 %v742_v33, %v2473_v43  ;;  %v875_v39 = vpop.permute.xlu1 %874  ;;  %v1052_v28 = vpop.permute.xlu0 %1051  ;;  %v1455_v43 = vrot.slane %v2634_v10, 7 }
 0x2b3   : > { %v876_v55 = vrot.slane %v875_v39, 1 }
 0x2b4   : > { %v753_v35 = vadd.f32 %v751_v42, %v744_v12  ;;  %v1456_v46 = vsel %vm624_vm4, %v1455_v43, %v2634_v10  ;;  %v1312_v10 = vsel %vm624_vm4, %v1311_v38, %v1310_v15 }
 0x2b5   : > { %v877_v53 = vsel %vm579_vm3, %v875_v39, %v876_v55  ;;  %v1185_v39 = vrot.slane %v2628_v54, 7  ;;  %v1053_v55 = vrot.slane %v1052_v28, 7 }
 0x2b6   : > { %v879_v36 = vadd.f32 %v877_v53, %v2478_v47  ;;  %v1270_v26 = vpop.permute.xlu1 %1269  ;;  %v1445_v33 = vpop.permute.xlu0 %1444 }
 0x2b7   : > { %v1271_v12 = vrot.slane %v1270_v26, 7  ;;  %v1446_v42 = vrot.slane %v1445_v33, 7 }
 0x2b8   : > { %v888_v45 = vadd.f32 %v886_v40, %v879_v36  ;;  %v731_v36 = vsel %vm579_vm3, %v2640_v16, %v730_v37  ;;  %v1186_v37 = vsel %vm624_vm4, %v1185_v39, %v2628_v54 }
 0x2b9   : > { %v1272_v47 = vsel %vm579_vm3, %v1271_v12, %v1270_v26  ;;  %v1447_v53 = vsel %vm624_vm4, %v1446_v42, %v1445_v33 }
 0x2ba   : > { %v1274_v44 = vadd.f32 %v1272_v47, %v2487_v51  ;;  %v1449_v6 = vadd.f32 %v1447_v53, %v1418_v50  ;;  %v780_v5 = vpop.permute.xlu1 %779  ;;  %v720_v4 = vpop.permute.xlu0 %719  ;;  %v919_v27 = vadd.f32 %v917_v7, %v888_v45  ;;  %v1054_v51 = vsel %vm624_vm4, %v1053_v55, %v1052_v28 }
 0x2bb   : > { %v781_v49 = vrot.slane %v780_v5, 7  ;;  %v721_v40 = vrot.slane %v720_v4, 1  ;;  %v1000_v53 = vrot.slane %v2672_v13, 1 }
 0x2bc   : > { %v1283_v26 = vadd.f32 %v1281_v1, %v1274_v44  ;;  %v1458_v33 = vadd.f32 %v1456_v46, %v1449_v6  ;;  %v928_v12 = vadd.f32 %v926_v22, %v919_v27  ;;  %v1321_v22 = vsel %vm624_vm4, %v1320_v60, %v2652_v29 }
 0x2bd   : > { %v782_v50 = vsel %vm624_vm4, %v781_v49, %v780_v5  ;;  %v722_v43 = vsel %vm579_vm3, %v720_v4, %v721_v40  ;;  %v1062_v27 = vrot.slane %v2656_v0, 7  ;;  %v1056_v5 = vadd.f32 %v1054_v51, %v2677_v24 }
 0x2be   : > { %v784_v34 = vadd.f32 %v782_v50, %v753_v35  ;;  %v724_v42 = vadd.f32 %v722_v43, %v2494_v56  ;;  %v1175_v7 = vpop.permute.xlu1 %1174  ;;  %v1115_v45 = vpop.permute.xlu0 %1114  ;;  %950 = vrot.lane.b32.xlu0 %v928_v12, %s1984_s22  ;;  %v1314_v16 = vadd.f32 %v1312_v10, %v1283_v26  ;;  %v1126_v24 = vsel %vm579_vm3, %v2644_v23, %v1125_v25 }
 0x2bf   : > { %v1176_v6 = vrot.slane %v1175_v7, 7  ;;  %v1116_v15 = vrot.slane %v1115_v45, 1  ;;  %v1001_v23 = vsel %vm579_vm3, %v2672_v13, %v1000_v53 }
 0x2c0   : > { %v793_v4 = vadd.f32 %v791_v61, %v784_v34  ;;  %v1323_v28 = vadd.f32 %v1321_v22, %v1314_v16  ;;  %v2741_v1 = vadd.f32 %v731_v36, %v724_v42  ;;  %v1063_v61 = vsel %vm624_vm4, %v1062_v27, %v2656_v0 }
 0x2c1   : > { %v1177_v56 = vsel %vm624_vm4, %v1176_v6, %v1175_v7  ;;  %v1117_v35 = vsel %vm579_vm3, %v1115_v45, %v1116_v15  ;;  %v1065_v39 = vadd.f32 %v1063_v61, %v1056_v5  ;;  %v1395_v0 = vrot.slane %v2681_v41, 1 }
 0x2c2   : > { %v1179_v38 = vadd.f32 %v1177_v56, %v2667_v17  ;;  %v1119_v29 = vadd.f32 %v1117_v35, %v2496_v57  ;;  %v1041_v55 = vpop.permute.xlu1 %1040  ;;  %v990_v47 = vpop.permute.xlu0 %989  ;;  %815 = vrot.lane.b32.xlu1 %v793_v4, %s1984_s22  ;;  %1345 = vrot.lane.b32.xlu0 %v1323_v28, %s1984_s22  ;;  %v588_v35 = vrot.slane %v2658_v31, 1 }
 0x2c3   : > { %v991_v46 = vrot.slane %v990_v47, 1  ;;  %v1396_v51 = vsel %vm579_vm3, %v2681_v41, %v1395_v0  ;;  %v1042_v45 = vrot.slane %v1041_v55, 7 }
 0x2c4   : > { %v1188_v54 = vadd.f32 %v1186_v37, %v1179_v38  ;;  %v2756_v17 = vadd.f32 %v1126_v24, %v1119_v29 }
 0x2c5   : > { %v992_v57 = vsel %vm579_vm3, %v990_v47, %v991_v46  ;;  %v1043_v41 = vsel %vm624_vm4, %v1042_v45, %v1041_v55  ;;  %v865_v55 = vrot.slane %v2660_v32, 1  ;;  %v589_v46 = vsel %vm579_vm3, %v2658_v31, %v588_v35 }
 0x2c6   : > { %v994_v44 = vadd.f32 %v992_v57, %v2499_v59  ;;  %v1434_v60 = vpop.permute.xlu1 %1433  ;;  %v1385_v49 = vpop.permute.xlu0 %1384  ;;  %1210 = vrot.lane.b32.xlu1 %v1188_v54, %s1984_s22  ;;  %1087 = vrot.lane.b32.xlu0 %v1065_v39, %s1984_s22  ;;  %v633_v54 = vrot.slane %v2687_v58, 7 }
 0x2c7   : > { %v1386_v40 = vrot.slane %v1385_v49, 1  ;;  %v1435_v6 = vrot.slane %v1434_v60, 7 }
 0x2c8   : > { %v1003_v36 = vadd.f32 %v1001_v23, %v994_v44  ;;  %v866_v23 = vsel %vm579_vm3, %v2660_v32, %v865_v55  ;;  %v634_v31 = vsel %vm624_vm4, %v633_v54, %v2687_v58  ;;  %v770_v32 = vrot.slane %v2650_v2, 7 }
 0x2c9   : > { %v1387_v26 = vsel %vm579_vm3, %v1385_v49, %v1386_v40  ;;  %v1436_v37 = vsel %vm624_vm4, %v1435_v6, %v1434_v60 }
 0x2ca   : > { %v1389_v12 = vadd.f32 %v1387_v26, %v2504_v63  ;;  %v2767_v10 = vpop.permute.xlu1 %672  ;;  %v622_v59 = vpop.permute.xlu0 %621  ;;  %1480 = vrot.lane.b32.xlu1 %v1458_v33, %s1984_s22  ;;  %v905_v26 = vrot.slane %v2690_v3, 7  ;;  %v771_v35 = vsel %vm624_vm4, %v770_v32, %v2650_v2 }
 0x2cb   : > { %v623_v47 = vrot.slane %v622_v59, 7 }
 0x2cc   : > { %v1398_v50 = vadd.f32 %v1396_v51, %v1389_v12  ;;  %v906_v58 = vsel %vm624_vm4, %v905_v26, %v2690_v3 }
 0x2cd   : > { %v625_v44 = vsel %vm624_vm4, %v623_v47, %v622_v59 }
 0x2ce   : > { %v2772_v43 = vpop.permute.xlu1 %943  ;;  %v895_v13 = vpop.permute.xlu0 %894 }
 0x2cf   : > { %v896_v60 = vrot.slane %v895_v13, 7 }
 0x2d2   : > { %v2774_v25 = vpop.permute.xlu1 %1338  ;;  %v1290_v34 = vpop.permute.xlu0 %1289 }
 0x2d6   : > { %v2776_v42 = vpop.permute.xlu1 %1080  ;;  %v1032_v7 = vpop.permute.xlu0 %1031 }
 0x2d7   : > { %v1033_v63 = vrot.slane %v1032_v7, 7 }
 0x2d9   : > { %v1034_v16 = vsel %vm624_vm4, %v1033_v63, %v1032_v7  ;;  %v1291_v7 = vrot.slane %v1290_v34, 7 }
 0x2da   : > { %v1036_v22 = vadd.f32 %v1034_v16, %v1003_v36  ;;  %v2779_v27 = vpop.permute.xlu1 %1473  ;;  %v1425_v33 = vpop.permute.xlu0 %1424  ;;  %v1260_v36 = vrot.slane %v2664_v48, 1 }
 0x2db   : > { %v1426_v15 = vrot.slane %v1425_v33, 7 }
 0x2dc   : > { %v2782_v5 = vadd.f32 %v1043_v41, %v1036_v22  ;;  %v1261_v22 = vsel %vm579_vm3, %v2664_v48, %v1260_v36  ;;  %v1165_v48 = vrot.slane %v2654_v30, 7 }
 0x2dd   : > { %v1427_v4 = vsel %vm624_vm4, %v1426_v15, %v1425_v33  ;;  %v1300_v33 = vrot.slane %v2695_v11, 7  ;;  %v1292_v15 = vsel %vm624_vm4, %v1291_v7, %v1290_v34 }
 0x2de   : > { %v1429_v28 = vadd.f32 %v1427_v4, %v1398_v50  ;;  %v577_v56 = vpop.permute.xlu1 %576  ;;  %v897_v50 = vsel %vm624_vm4, %v896_v60, %v895_v13 }
 0x2df   : > { %v578_v38 = vrot.slane %v577_v56, 1  ;;  %v1301_v3 = vsel %vm624_vm4, %v1300_v33, %v2695_v11 }
 0x2e0   : > { %v2787_v29 = vadd.f32 %v1436_v37, %v1429_v28 }
 0x2e1   : > { %v580_v24 = vsel %vm579_vm3, %v577_v56, %v578_v38 }
 0x2e2   : > { %v582_v61 = vadd.f32 %v580_v24, %v2511_v20  ;;  %v855_v53 = vpop.permute.xlu1 %854 }
 0x2e3   : > { %v856_v39 = vrot.slane %v855_v53, 1 }
 0x2e4   : > { %v591_v57 = vadd.f32 %v589_v46, %v582_v61  ;;  %v810_v61 = vrot.slane %v2692_v14, 7 }
 0x2e5   : > { %v857_v49 = vsel %vm579_vm3, %v855_v53, %v856_v39 }
 0x2e6   : > { %v627_v0 = vadd.f32 %v625_v44, %v591_v57  ;;  %v859_v40 = vadd.f32 %v857_v49, %v2515_v8  ;;  %v1250_v20 = vpop.permute.xlu1 %1249  ;;  %v811_v39 = vsel %vm665_vm5, %v810_v61, %v2692_v14  ;;  %v1205_v57 = vrot.slane %v2697_v62, 7 }
 0x2e7   : > { %v1251_v12 = vrot.slane %v1250_v20, 1 }
 0x2e8   : > { %v868_v51 = vadd.f32 %v866_v23, %v859_v40  ;;  %v636_v59 = vadd.f32 %v634_v31, %v627_v0  ;;  %v663_v23 = vpop.permute.xlu0 %662 }
 0x2e9   : > { %v1252_v45 = vsel %vm579_vm3, %v1250_v20, %v1251_v12  ;;  %v664_v31 = vrot.slane %v663_v23, 7  ;;  %v674_v12 = vrot.slane %v2767_v10, 7  ;;  %vm1224_vm3 = vcmask 384000  }
 0x2ea   : > { %v899_v63 = vadd.f32 %v897_v50, %v868_v51  ;;  %v1254_v8 = vadd.f32 %v1252_v45, %v2517_v9  ;;  %v760_v16 = vpop.permute.xlu1 %759 }
 0x2eb   : > { %v761_v41 = vrot.slane %v760_v16, 7  ;;  %v666_v14 = vsel %vm665_vm5, %v664_v31, %v663_v23  ;;  %v675_v7 = vsel %vm665_vm5, %v674_v12, %v2767_v10  ;;  %v1340_v10 = vrot.slane %v2774_v25, 7 }
 0x2ec   : > { %v1263_v6 = vadd.f32 %v1261_v22, %v1254_v8  ;;  %v908_v13 = vadd.f32 %v906_v58, %v899_v63  ;;  %v935_v40 = vpop.permute.xlu0 %934  ;;  %v668_v51 = vadd.f32 %v666_v14, %v636_v59 }
 0x2ed   : > { %v762_v4 = vsel %vm624_vm4, %v761_v41, %v760_v16  ;;  %v936_v8 = vrot.slane %v935_v40, 7  ;;  %v945_v16 = vrot.slane %v2772_v43, 7 }
 0x2ee   : > { %v1294_v28 = vadd.f32 %v1292_v15, %v1263_v6  ;;  %v764_v56 = vadd.f32 %v762_v4, %v2741_v1  ;;  %v1155_v9 = vpop.permute.xlu1 %1154  ;;  %v1166_v1 = vsel %vm624_vm4, %v1165_v48, %v2654_v30  ;;  %v1206_v30 = vsel %vm665_vm5, %v1205_v57, %v2697_v62 }
 0x2ef   : > { %v1156_v37 = vrot.slane %v1155_v9, 7  ;;  %v677_v32 = vadd.f32 %v675_v7, %v668_v51  ;;  %v937_v22 = vsel %vm665_vm5, %v936_v8, %v935_v40  ;;  %v946_v41 = vsel %vm665_vm5, %v945_v16, %v2772_v43 }
 0x2f0   : > { %v773_v38 = vadd.f32 %v771_v35, %v764_v56  ;;  %v1303_v47 = vadd.f32 %v1301_v3, %v1294_v28  ;;  %v1330_v20 = vpop.permute.xlu0 %1329  ;;  %v939_v33 = vadd.f32 %v937_v22, %v908_v13  ;;  %v1341_v13 = vsel %vm665_vm5, %v1340_v10, %v2774_v25 }
 0x2f1   : > { %v1157_v24 = vsel %vm624_vm4, %v1156_v37, %v1155_v9  ;;  %v1331_v58 = vrot.slane %v1330_v20, 7  ;;  %v1475_v25 = vrot.slane %v2779_v27, 7  ;;  %v3036_v22 = vmov 0 }
 0x2f2   : > { %v1159_v34 = vadd.f32 %v1157_v24, %v2756_v17  ;;  %v800_v55 = vpop.permute.xlu1 %799  ;;  %v948_v4 = vadd.f32 %v946_v41, %v939_v33 }
 0x2f3   : > { %v801_v53 = vrot.slane %v800_v55, 7  ;;  %v1332_v6 = vsel %vm665_vm5, %v1331_v58, %v1330_v20  ;;  %v1476_v23 = vsel %vm665_vm5, %v1475_v25, %v2779_v27 }
 0x2f4   : > { %v1168_v2 = vadd.f32 %v1166_v1, %v1159_v34  ;;  %v1072_v36 = vpop.permute.xlu0 %1071  ;;  %v1334_v28 = vadd.f32 %v1332_v6, %v1303_v47 }
 0x2f5   : > { %v802_v46 = vsel %vm665_vm5, %v801_v53, %v800_v55  ;;  %v1073_v56 = vrot.slane %v1072_v36, 7 }
 0x2f6   : > { %v804_v54 = vadd.f32 %v802_v46, %v773_v38  ;;  %v1195_v11 = vpop.permute.xlu1 %1194  ;;  %v1343_v43 = vadd.f32 %v1341_v13, %v1334_v28 }
 0x2f7   : > { %v1196_v44 = vrot.slane %v1195_v11, 7  ;;  %v1074_v34 = vsel %vm665_vm5, %v1073_v56, %v1072_v36 }
 0x2f8   : > { %v813_v17 = vadd.f32 %v811_v39, %v804_v54  ;;  %v1465_v26 = vpop.permute.xlu0 %1464  ;;  %v1082_v54 = vrot.slane %v2776_v42, 7  ;;  %v1076_v57 = vadd.f32 %v1074_v34, %v2782_v5 }
 0x2f9   : > { %v1197_v60 = vsel %vm665_vm5, %v1196_v44, %v1195_v11  ;;  %v1466_v9 = vrot.slane %v1465_v26, 7 }
 0x2fa   : > { %v1199_v49 = vadd.f32 %v1197_v60, %v1168_v2 }
 0x2fb   : > { %v1467_v55 = vsel %vm665_vm5, %v1466_v9, %v1465_v26 }
 0x2fc   : > { %v1208_v0 = vadd.f32 %v1206_v30, %v1199_v49  ;;  %v1469_v44 = vadd.f32 %v1467_v55, %v2787_v29  ;;  %v1083_v30 = vsel %vm665_vm5, %v1082_v54, %v2776_v42  ;;  %v551_v42 = vld [vmem:[%s3035_s20] sm:$0x3] }
 0x2fd   : > { %v1085_v5 = vadd.f32 %v1083_v30, %v1076_v57  ;;  %v686_v27 = vadd.s32 4294967293, %v551_v42  ;;  %v821_v14 = vadd.s32 4294967294, %v551_v42  ;;  %v1216_v51 = vadd.s32 1, %v551_v42 }
 0x2fe   : > { %v1478_v36 = vadd.f32 %v1476_v23, %v1469_v44  ;;  %v1351_v7 = vadd.s32 2, %v551_v42  ;;  %v1518_v44 = vsub.s32 0, %v2280_v52 }
 0x2ff   : > { %vm687_vm7 = vcmp.ge.s32.totalorder %v686_v27, 0  ;;  %vm688_vm9 = vcmp.lt.s32.totalorder %v686_v27, 16  ;;  %vm822_vm10 = vcmp.ge.s32.totalorder %v821_v14, 0  ;;  %vm1217_vm12 = vcmp.ge.s32.totalorder %v1216_v51, 0 }
 0x300   : > { %vm1218_vm13 = vcmp.lt.s32.totalorder %v1216_v51, 16  ;;  %vm823_vm14 = vcmp.lt.s32.totalorder %v821_v14, 16  ;;  %vm2866_vm0 = vmand %vm687_vm7, %vm688_vm9  ;;  %vm1352_vm1 = vcmp.ge.s32.totalorder %v1351_v7, 0  ;;  %vm1353_vm2 = vcmp.lt.s32.totalorder %v1351_v7, 16 }
 0x301   : > { %v3037_v22 = vsel %vm2866_vm0, 4294967295, %v3036_v22  ;;  %vm2872_vm8 = vmand %vm1217_vm12, %vm1218_vm13  ;;  %vm3042_vm0 = vcmask 416768   ;;  %vm3045_vm13 = vcmask 375808  }
 0x302   : > { %vm2877_vm7 = vmand %vm822_vm10, %vm823_vm14  ;;  %vm1494_vm14 = vcmask 367616  }
 0x303   : > { %vm2883_vm12 = vmand %vm1352_vm1, %vm1353_vm2  ;;  %vm3049_vm1 = vnez %v3037_v22 }
 0x318   : > { %v680_v50 = vpop.permute.xlu0 %679 }
 0x319   : > { %v681_v45 = vrot.slane %v680_v50, 1 }
 0x31b   : > { %v683_v62 = vsel %vm682_vm6, %v680_v50, %v681_v45 }
 0x31c   : > { %v685_v63 = vadd.f32 %v683_v62, %v677_v32  ;;  %v956_v32 = vadd.s32 4294967295, %v551_v42 }
 0x31e   : > { %691 = vrot.lane.b32.xlu0 %v685_v63, %s1985_s16  ;;  %v1486_v63 = vadd.s32 3, %v551_v42  ;;  %vm957_vm4 = vcmp.ge.s32.totalorder %v956_v32, 0  ;;  %vm958_vm5 = vcmp.lt.s32.totalorder %v956_v32, 16 }
 0x320   : > { %vm1487_vm9 = vcmp.ge.s32.totalorder %v1486_v63, 0  ;;  %vm1488_vm15 = vcmp.lt.s32.totalorder %v1486_v63, 16 }
 0x330   : > { %v951_v59 = vpop.permute.xlu0 %950 }
 0x331   : > { %v952_v15 = vrot.slane %v951_v59, 1 }
 0x333   : > { %v953_v35 = vsel %vm682_vm6, %v951_v59, %v952_v15  ;;  %v3038_v59 = vmov 0 }
 0x334   : > { %v955_v48 = vadd.f32 %v953_v35, %v948_v4  ;;  %v816_v3 = vpop.permute.xlu1 %815  ;;  %v1346_v37 = vpop.permute.xlu0 %1345  ;;  %v3039_v59 = vsel %vm2872_vm8, 4294967295, %v3038_v59  ;;  %vm2888_vm8 = vmand %vm957_vm4, %vm958_vm5 }
 0x335   : > { %v817_v38 = vrot.slane %v816_v3, 1  ;;  %v1347_v24 = vrot.slane %v1346_v37, 1  ;;  %vm3048_vm10 = vnez %v3039_v59 }
 0x336   : > { %961 = vrot.lane.b32.xlu0 %v955_v48, %s1986_s28 }
 0x337   : > { %v818_v47 = vsel %vm682_vm6, %v816_v3, %v817_v38  ;;  %v1348_v1 = vsel %vm682_vm6, %v1346_v37, %v1347_v24 }
 0x338   : > { %v820_v61 = vadd.f32 %v818_v47, %v813_v17  ;;  %v1350_v53 = vadd.f32 %v1348_v1, %v1343_v43  ;;  %v1211_v2 = vpop.permute.xlu1 %1210  ;;  %v1088_v46 = vpop.permute.xlu0 %1087 }
 0x339   : > { %v1212_v11 = vrot.slane %v1211_v2, 1  ;;  %v1089_v39 = vrot.slane %v1088_v46, 1 }
 0x33a   : > { %826 = vrot.lane.b32.xlu1 %v820_v61, %s1987_s1  ;;  %1356 = vrot.lane.b32.xlu0 %v1350_v53, %s1988_s2 }
 0x33b   : > { %v1213_v60 = vsel %vm682_vm6, %v1211_v2, %v1212_v11  ;;  %v1090_v40 = vsel %vm682_vm6, %v1088_v46, %v1089_v39 }
 0x33c   : > { %v1215_v17 = vadd.f32 %v1213_v60, %v1208_v0  ;;  %v1481_v49 = vpop.permute.xlu1 %1480  ;;  %v1092_v31 = vadd.f32 %v1090_v40, %v1085_v5  ;;  %v1522_v60 = vsub.s32 1, %v2280_v52  ;;  %v3055_v52 = vld [vmem:[#allocation23_spill] sm:$0xff] }
 0x33d   : > { %v1482_v20 = vrot.slane %v1481_v49, 1 }
 0x33e   : > { %1221 = vrot.lane.b32.xlu1 %v1215_v17, %s1989_s3 }
 0x33f   : > { %v1483_v29 = vsel %vm682_vm6, %v1481_v49, %v1482_v20  ;;  %vm964_vm6 = vcmask 400384  }
 0x340   : > { %v1485_v26 = vadd.f32 %v1483_v29, %v1478_v36  ;;  %v3053_v36 = vld [vmem:[#allocation22_spill] sm:$0xff] }
 0x342   : > { %1500 = vrot.lane.b32.xlu1 %v1092_v31, %s1990_s4  ;;  %1491 = vrot.lane.b32.xlu0 %v1485_v26, %s1991_s5 }
 0x390   : > { %v692_v0 = vpop.permute.xlu0 %691 }
 0x391   : > { %v693_v8 = vrot.slane %v692_v0, 1 }
 0x393   : > { %v695_v15 = vsel %vm3042_vm0, %v692_v0, %v693_v8  ;;  %vm1489_vm0 = vmand %vm1487_vm9, %vm1488_vm15 }
 0x394   : > { %v697_v43 = vsel %vm3049_vm1, %v695_v15, 0.0 }
 0x3a8   : > { %v962_v12 = vpop.permute.xlu0 %961 }
 0x3a9   : > { %v963_v58 = vrot.slane %v962_v12, 1 }
 0x3ab   : > { %v965_v35 = vsel %vm964_vm6, %v962_v12, %v963_v58 }
 0x3ac   : > { %v827_v50 = vpop.permute.xlu1 %826  ;;  %v1357_v45 = vpop.permute.xlu0 %1356  ;;  %v967_v55 = vsel %vm2888_vm8, %v965_v35, 0.0 }
 0x3ad   : > { %v828_v62 = vrot.slane %v827_v50, 1  ;;  %v1358_v16 = vrot.slane %v1357_v45, 1 }
 0x3af   : > { %v830_v6 = vsel %vm829_vm11, %v827_v50, %v828_v62  ;;  %v1360_v28 = vsel %vm3045_vm13, %v1357_v45, %v1358_v16  ;;  %vm1503_vm11 = vcmask 392192  }
 0x3b0   : > { %v1222_v33 = vpop.permute.xlu1 %1221  ;;  %v832_v13 = vsel %vm2877_vm7, %v830_v6, 0.0  ;;  %v1362_v34 = vsel %vm2883_vm12, %v1360_v28, 0.0 }
 0x3b1   : > { %v1223_v41 = vrot.slane %v1222_v33, 1  ;;  %v1498_v53 = vadd.f32 %v832_v13, %v697_v43 }
 0x3b3   : > { %v1225_v56 = vsel %vm1224_vm3, %v1222_v33, %v1223_v41 }
 0x3b4   : > { %v1227_v48 = vsel %vm3048_vm10, %v1225_v56, 0.0  ;;  %v1501_v3 = vpop.permute.xlu1 %1500  ;;  %v1492_v37 = vpop.permute.xlu0 %1491 }
 0x3b5   : > { %v1502_v38 = vrot.slane %v1501_v3, 1  ;;  %v1493_v24 = vrot.slane %v1492_v37, 1  ;;  %v1507_v47 = vadd.f32 %v1362_v34, %v1227_v48 }
 0x3b7   : > { %v1504_v1 = vsel %vm1503_vm11, %v1501_v3, %v1502_v38  ;;  %v1495_v61 = vsel %vm1494_vm14, %v1492_v37, %v1493_v24 }
 0x3b8   : > { %v1506_v2 = vadd.f32 %v1504_v1, %v967_v55  ;;  %v1497_v46 = vsel %vm1489_vm0, %v1495_v61, 0.0 }
 0x3b9   : > { %v1509_v54 = vadd.f32 %v1507_v47, %v1497_v46 }
 0x3ba   : > { %v1508_v25 = vadd.f32 %v1506_v2, %v1498_v53 }
 0x3bc   : > { %v1510_v11 = vadd.f32 %v1509_v54, %v1508_v25 }
 0x3be   : > { %v1511_v39 = vmul.f32 0.5, %v1510_v11 }
 0x3c0   : > { %1854 = vtanh.f32 %v1511_v39 }
 0x3ca   : > { %v1855_v57 = vpop.eup %1854 }
 0x3cb   : > { %v1513_v17 = vadd.f32 1.0, %v1855_v57 }
 0x3cd   : > { %v1514_v49 = vmul.f32 0.5, %v1513_v17 }
 0x3cf   : > { %v1519_v30 = vrot.slane %v1514_v49, %v1518_v44  ;;  %v1523_v23 = vrot.slane %v1514_v49, %v1522_v60 }
 0x3d1   : > { %v1526_v40 = vmul.f32 %v1519_v30, %v2240_v18  ;;  %v1527_v20 = vmul.f32 %v1523_v23, %v2243_v19  ;;  %v1528_v5 = vmul.f32 %v1519_v30, %v2246_v21  ;;  %v1529_v29 = vmul.f32 %v1523_v23, %v3053_v36  ;;  %v3057_v18 = vld [vmem:[#allocation24_spill] sm:$0xff]  ;;  %v3058_v19 = vld [vmem:[#allocation25_spill] sm:$0xff]  ;;  %v3059_v21 = vld [vmem:[#allocation26_spill] sm:$0xff] }
 0x3d2   : > { %v1530_v31 = vmul.f32 %v1519_v30, %v3055_v52  ;;  %v1531_v26 = vmul.f32 %v1523_v23, %v3057_v18  ;;  %v1532_v0 = vmul.f32 %v1519_v30, %v3058_v19  ;;  %v1533_v42 = vmul.f32 %v1523_v23, %v3059_v21 }
 0x3d3   : > { %1534 = vst [vmem:[%s256_s6] sm:$0xff] %v1526_v40  ;;  %1535 = vst [vmem:[%s256_s6 + $0x8] sm:$0xff] %v1527_v20 }
 0x3d4   : > { %1536 = vst [vmem:[%s256_s6 + $0x10] sm:$0xff] %v1528_v5  ;;  %1537 = vst [vmem:[%s256_s6 + $0x18] sm:$0xff] %v1529_v29 }
 0x3d5   : > { %1538 = vst [vmem:[%s256_s6 + $0x20] sm:$0xff] %v1530_v31  ;;  %1539 = vst [vmem:[%s256_s6 + $0x28] sm:$0xff] %v1531_v26 }
 0x3d6   : > { %1540 = vst [vmem:[%s256_s6 + $0x30] sm:$0xff] %v1532_v0  ;;  %1541 = vst [vmem:[%s256_s6 + $0x38] sm:$0xff] %v1533_v42 }
 0x3d7   : > { %1914 = shalt.err (!%p1911_p11)
}
 0x3d8   : > { %s1915_s11 = scalar_lea.hbm %s2915_s13, 1024  ;;  %s1919_s10 = scalar_lea.hbm %s3054_s7, 2048 }
 0x3d9   : > { %p1916_p0 = scmp.ne.s32.totalorder %s2915_s13, %s1915_s11  ;;  %p1920_p6 = scmp.lt.u32.totalorder %s2915_s13, %s3054_s7 }
 0x3da   : > { %p1921_p3 = scmp.lt.u32.totalorder %s1919_s10, %s1915_s11  ;;  %p1923_p5 = scmp.lt.u32.totalorder %s1915_s11, %s2915_s13 }
 0x3db   : > { %p1917_p2 = pnand %p1916_p0, %p3060_p12 }
 0x3dc   : > { %p1922_p13 = por %p1921_p3, %p1920_p6 }
 0x3dd   : > { %p1918_p7 = pneg %p1917_p2 }
 0x3de   : > { %p1924_p8 = por %p1923_p5, %p1922_p13 }
 0x3e0   : > { %p1925_p9 = pnand %p1924_p8, %p1918_p7 }
 0x3e2   : > { %1928 = shalt.err (!%p1925_p9)
}
 0x3e3   : > { %s1993_s28 = smov 256   ;;  %s1994_s1 = smov 16  }
 0x3e4   : > { %1762 = dma.vmem_to_hbm [thread:$0]  (%p3060_p12), %s2917_s14, 1024, %s2915_s13, %s1543_s8, %s1993_s28, %s1993_s28, %s1994_s1  }
 0x3e5 PF: > { %s3061_s2 = sld [smem:[#allocation12_spill]]  ;;  %s3062_s3 = sld [smem:[#allocation20_spill]] }
 0x3e6   : > { %s3063_s4 = sld [smem:[#allocation15_spill]] }
 0x3eb   : > { %s1571_s5 = sand.u32 1, %s3061_s2   ;;  %p3064_p10 = scmp.ne.s32.totalorder %s3062_s3, 0 }
 0x3ec   : > { %p3065_p1 = scmp.ge.s32.totalorder %s3063_s4, 2  ;;  %s1572_s18 = scalar_lea.sflag [#allocation5], %s1571_s5 }
 0x3ee   : > { %p1773_p4 = pnand %p3065_p1, %p3064_p10 }
 0x3f0   : > { %1954 = dma.done.wait (!%p1773_p4), %s1572_s18, 1024  }
 0x3f1   : > { %1956 = vsyncadd (!%p1773_p4), %s1572_s18, 4294966272  ;;  %s3066_s21 = sld [smem:[#allocation17_spill]]  ;;  %s3067_s18 = sld [smem:[#allocation13_spill]] }
 0x3f2   : > { %s3068_s19 = sld [smem:[#allocation14_spill]]  ;;  %s3069_s20 = sld [smem:[#allocation18_spill]] }
 0x3f7   : > { %p19_p11 = scmp.ge.s32.totalorder %s3066_s21, 4  }
 0x3f9   :  { %21 = sbr.rel (!%p19_p11) target bundleno = 13 (0xd), region = 95 }
 0x400   :  { %1577 = vsyncpa [#allocation4], 1 }
 0x401   :  { %1579 = vsyncpa [#allocation4 + $0x1], 1 }
 0x402   :  { %1580 = vsyncpa [#allocation5], 1 }
 0x403   :  { %1582 = vsyncpa [#allocation5 + $0x1], 1 }
 0x404   :  { %1583 = vsyncpa [#allocation6], 1 }
 0x405   :  { %1585 = vsyncpa [#allocation6 + $0x1], 1 }

</bundles_post_ra>
